<compile_context>
chip_gen: v5e
topology: v5e:2x2
jax: 0.10.0
libtpu: 0.0.40
codegen_flags: <defaults>
</compile_context>

<pallas_src>
import jax
import jax.numpy as jnp
import numpy as np
from jax.experimental import pallas as pl
from jax.experimental.pallas import tpu as pltpu

CLS_ID = 101
SEP_ID = 102
PAD_ID = 0


def _round_up(x, m):
    return ((x + m - 1) // m) * m


def _cdiv(a, b):
    return -(-a // b)


def _tokenize_kernel(raw_ref, len_ref, ids_ref, mask_ref):
    TB, M = raw_ref.shape
    # position index along the sequence axis (lanes)
    pos = jax.lax.broadcasted_iota(jnp.int32, (TB, M), dimension=1)

    # usable raw tokens per row (truncation leaves room for [CLS] + [SEP])
    n = jnp.minimum(len_ref[...], M - 2)  # (TB, 1) broadcasts over lanes
    sep_pos = n + 1

    # Shift raw tokens right by one so position p holds raw[p-1].
    # NOTE: pltpu.roll wraps raw[b, M-1] into position 0, but that slot is
    # always overwritten by CLS_ID below, so the wraparound is benign.  The
    # rotate runs on the XLU slot, which is otherwise idle here.
    shifted = pltpu.roll(raw_ref[...], shift=1, axis=1)

    # Attention mask computed once, reused in the ids selects.
    mask_b = pos <= sep_pos  # True for [CLS] .. [SEP] inclusive

    # Flattened select chain (short dep chain, fewer live vregs).
    ids = jnp.where(mask_b, shifted, jnp.int32(PAD_ID))
    ids = jnp.where(pos == sep_pos, jnp.int32(SEP_ID), ids)
    ids = jnp.where(pos == 0, jnp.int32(CLS_ID), ids)

    ids_ref[...] = ids
    # int32 kept for parity with HF output; int8 would cut HBM writeback ~37%.
    mask_ref[...] = mask_b.astype(jnp.int32)


def _tokenize_jax(raw, lens, max_length):
    """Fused-XLA fallback for tiny batches (same semantics as the kernel)."""
    B = raw.shape[0]
    pos = jax.lax.broadcasted_iota(jnp.int32, (B, max_length), dimension=1)
    n = jnp.minimum(lens.reshape(B, 1), max_length - 2)
    sep_pos = n + 1
    shifted = jnp.concatenate(
        [jnp.zeros((B, 1), jnp.int32), raw[:, : max_length - 1]], axis=1
    )
    mask_b = pos <= sep_pos
    ids = jnp.where(mask_b, shifted, jnp.int32(PAD_ID))
    ids = jnp.where(pos == sep_pos, jnp.int32(SEP_ID), ids)
    ids = jnp.where(pos == 0, jnp.int32(CLS_ID), ids)
    return ids, mask_b.astype(jnp.int32)


def text_tokenizer_forward(
    raw_tokens, lengths, max_length=256, batch_tile=1024, small_batch_fallback=True
):
    """raw_tokens: (B, max_length) int32 token ids (unpadded stream, extra
    entries ignored); lengths: (B,) int32 number of valid raw tokens."""
    B = raw_tokens.shape[0]
    assert raw_tokens.shape == (B, max_length)

    raw = raw_tokens.astype(jnp.int32)
    lens = lengths.astype(jnp.int32)

    # Tiny batches: pallas_call launch + single-step overhead dominates a pure
    # streaming op; a fused XLA expression is strictly faster there.
    if small_batch_fallback and B * max_length * 4 < (256 << 10):
        ids, mask = _tokenize_jax(raw, lens, max_length)
        return {"input_ids": ids, "attention_mask": mask}

    # ---- tile selection (pure HBM-streaming kernel, so big lane-dense tiles) ----
    bytes_per_row = 3 * max_length * 4            # raw in + ids out + mask out
    vmem_budget = 24 << 20                         # headroom under 32 MiB scoped limit
    tb_cap = max(8, ((vmem_budget // (2 * bytes_per_row)) // 8) * 8)
    TB = min(batch_tile, tb_cap, _round_up(B, 8))
    if B <= TB:
        # Split the batch in two so the "parallel" grid axis keeps both v7x
        # TensorCores busy (harmless on single-TC v5e/v6e).
        TB = max(8, _round_up(_cdiv(B, 2), 8))
    grid = (_cdiv(B, TB),)                         # partial last tile allowed

    lens2 = lens.reshape(B, 1)

    ids, mask = pl.pallas_call(
        _tokenize_kernel,
        out_shape=(
            jax.ShapeDtypeStruct((B, max_length), jnp.int32),
            jax.ShapeDtypeStruct((B, max_length), jnp.int32),
        ),
        grid=grid,
        in_specs=[
            pl.BlockSpec((TB, max_length), lambda i: (i, 0)),
            pl.BlockSpec((TB, 1), lambda i: (i, 0)),
        ],
        out_specs=(
            pl.BlockSpec((TB, max_length), lambda i: (i, 0)),
            pl.BlockSpec((TB, max_length), lambda i: (i, 0)),
        ),
        compiler_params=pltpu.CompilerParams(
            dimension_semantics=("parallel",),
            vmem_limit_bytes=32 << 20,
        ),
        cost_estimate=pl.CostEstimate(
            flops=0,
            transcendentals=0,
            bytes_accessed=3 * B * max_length * 4 + B * 4,
        ),
    )(raw, lens2)

    return {"input_ids": ids, "attention_mask": mask}


def _reference(raw_tokens, lengths, max_length):
    # pure-numpy reference of the padding/truncation semantics
    raw = np.asarray(jax.device_get(raw_tokens))
    lens = np.asarray(jax.device_get(lengths))
    B = raw.shape[0]
    ids = np.zeros((B, max_length), np.int32)
    mask = np.zeros((B, max_length), np.int32)
    for b in range(B):
        n = int(min(int(lens[b]), max_length - 2))
        ids[b, 0] = CLS_ID
        ids[b, 1 : n + 1] = raw[b, :n]
        ids[b, n + 1] = SEP_ID
        mask[b, : n + 2] = 1
    return ids, mask


if __name__ == "__main__":
    # TODO(synk): actual string -> WordPiece-id tokenization (python-string /
    # vocab processing inside DistilBertTokenizerFast) has no Pallas/TPU
    # equivalent; deterministic synthetic token-id streams are used instead.
    key = jax.random.PRNGKey(0)
    MAX_LEN = 256
    k1, k2, k3, k4 = jax.random.split(key, 4)

    # Case 1: tiny batch (module demo scale) -> fused-XLA fallback path.
    B_small = 2
    raw_small = jax.random.randint(k1, (B_small, MAX_LEN), 1000, 30000, dtype=jnp.int32)
    lens_small = jnp.array([8, 300], dtype=jnp.int32)  # one short, one truncated
    out_small = text_tokenizer_forward(raw_small, lens_small, max_length=MAX_LEN)
    jax.block_until_ready(out_small)
    ref_ids, ref_mask = _reference(raw_small, lens_small, MAX_LEN)
    assert (np.asarray(out_small["input_ids"]) == ref_ids).all()
    assert (np.asarray(out_small["attention_mask"]) == ref_mask).all()

    # Case 2: larger batch -> Pallas path (2 "parallel" grid steps, partial
    # last tile, no pad/slice copies).
    B_big = 600
    raw_big = jax.random.randint(k3, (B_big, MAX_LEN), 1000, 30000, dtype=jnp.int32)
    lens_big = jax.random.randint(k4, (B_big,), 0, 400, dtype=jnp.int32)
    out_big = text_tokenizer_forward(raw_big, lens_big, max_length=MAX_LEN)
    jax.block_until_ready(out_big)
    ref_ids_b, ref_mask_b = _reference(raw_big, lens_big, MAX_LEN)
    assert (np.asarray(out_big["input_ids"]) == ref_ids_b).all()
    assert (np.asarray(out_big["attention_mask"]) == ref_mask_b).all()

    print("KERNEL_OK")
</pallas_src>

<mosaic_0001>
module attributes {stable_mosaic.version = 11 : i64} {
  func.func @_tokenize_kernel(%arg0: i32, %arg1: memref<304x256xi32, #tpu.memory_space<vmem>>, %arg2: memref<304x1xi32, #tpu.memory_space<vmem>>, %arg3: memref<304x256xi32, #tpu.memory_space<vmem>>, %arg4: memref<304x256xi32, #tpu.memory_space<vmem>>) attributes {dimension_semantics = [#tpu.dimension_semantics<parallel>], iteration_bounds = array<i64: 2>, scalar_prefetch = 0 : i64, scratch_operands = 0 : i64, tpu.core_type = #tpu.core_type<tc>, window_params = [{transform_indices = @transform_0, window_bounds = array<i64: 304, 256>}, {transform_indices = @transform_1, window_bounds = array<i64: 304, 1>}, {transform_indices = @transform_2, window_bounds = array<i64: 304, 256>}, {transform_indices = @transform_3, window_bounds = array<i64: 304, 256>}]} {
    %0 = tpu.iota {dimensions = array<i32: 1>} : vector<304x256xi32>
    %c0 = arith.constant 0 : index
    %c0_0 = arith.constant 0 : index
    %1 = vector.load %arg2[%c0, %c0_0] : memref<304x1xi32, #tpu.memory_space<vmem>>, vector<304x1xi32>
    %c254_i32 = arith.constant 254 : i32
    %2 = vector.broadcast %c254_i32 : i32 to vector<304x1xi32>
    %3 = arith.minsi %1, %2 : vector<304x1xi32>
    %c1_i32 = arith.constant 1 : i32
    %4 = vector.broadcast %c1_i32 : i32 to vector<304x1xi32>
    %5 = arith.addi %3, %4 : vector<304x1xi32>
    %c0_1 = arith.constant 0 : index
    %c0_2 = arith.constant 0 : index
    %6 = vector.load %arg1[%c0_1, %c0_2] : memref<304x256xi32, #tpu.memory_space<vmem>>, vector<304x256xi32>
    %c1_i32_3 = arith.constant 1 : i32
    %7 = tpu.dynamic_rotate %6 by %c1_i32_3 dim 1 : vector<304x256xi32>, i32 -> vector<304x256xi32>
    %8 = vector.broadcast %5 : vector<304x1xi32> to vector<304x256xi32>
    %9 = arith.cmpi sle, %0, %8 : vector<304x256xi32>
    %c0_i32 = arith.constant 0 : i32
    %10 = vector.broadcast %c0_i32 : i32 to vector<304x256xi32>
    %11 = arith.select %9, %7, %10 : vector<304x256xi1>, vector<304x256xi32>
    %12 = vector.broadcast %5 : vector<304x1xi32> to vector<304x256xi32>
    %13 = arith.cmpi eq, %0, %12 : vector<304x256xi32>
    %c102_i32 = arith.constant 102 : i32
    %14 = vector.broadcast %c102_i32 : i32 to vector<304x256xi32>
    %15 = arith.select %13, %14, %11 : vector<304x256xi1>, vector<304x256xi32>
    %c0_i32_4 = arith.constant 0 : i32
    %16 = vector.broadcast %c0_i32_4 : i32 to vector<304x256xi32>
    %17 = arith.cmpi eq, %0, %16 : vector<304x256xi32>
    %c101_i32 = arith.constant 101 : i32
    %18 = vector.broadcast %c101_i32 : i32 to vector<304x256xi32>
    %19 = arith.select %17, %18, %15 : vector<304x256xi1>, vector<304x256xi32>
    %c0_5 = arith.constant 0 : index
    %c0_6 = arith.constant 0 : index
    %20 = vector.load %arg3[%c0_5, %c0_6] : memref<304x256xi32, #tpu.memory_space<vmem>>, vector<304x256xi32>
    tpu.vector_store %arg3[%c0_5, %c0_6], %19 {strides = array<i32>} : memref<304x256xi32, #tpu.memory_space<vmem>>, vector<304x256xi32>,
    %21 = arith.extui %9 : vector<304x256xi1> to vector<304x256xi32>
    %c0_7 = arith.constant 0 : index
    %c0_8 = arith.constant 0 : index
    %22 = vector.load %arg4[%c0_7, %c0_8] : memref<304x256xi32, #tpu.memory_space<vmem>>, vector<304x256xi32>
    tpu.vector_store %arg4[%c0_7, %c0_8], %21 {strides = array<i32>} : memref<304x256xi32, #tpu.memory_space<vmem>>, vector<304x256xi32>,
    return
  }
  func.func @transform_0(%arg0: i32) -> (i32, i32) {
    %c0_i32 = arith.constant 0 : i32
    %c0_i32_0 = arith.constant 0 : i32
    return %arg0, %c0_i32 : i32, i32
  }
  func.func @transform_1(%arg0: i32) -> (i32, i32) {
    %c0_i32 = arith.constant 0 : i32
    %c0_i32_0 = arith.constant 0 : i32
    return %arg0, %c0_i32 : i32, i32
  }
  func.func @transform_2(%arg0: i32) -> (i32, i32) {
    %c0_i32 = arith.constant 0 : i32
    %c0_i32_0 = arith.constant 0 : i32
    return %arg0, %c0_i32 : i32, i32
  }
  func.func @transform_3(%arg0: i32) -> (i32, i32) {
    %c0_i32 = arith.constant 0 : i32
    %c0_i32_0 = arith.constant 0 : i32
    return %arg0, %c0_i32 : i32, i32
  }
}

</mosaic_0001>

<bundles_post_ra>
// kernel: tpu_custom_call.1
= control target key start
LH: loop header
LB: loop body
LE: loop exit
PB: predicated region body
PF: predicated region fallthrough
CT: control target
= control target key end

     0   :  { %9 = vsyncpa [#allocation3], 0  ;;  %s3797_s0 = inlined_call_operand.hbm [shape: s32[600,256], index: 0, kind: input, shape index: {}]   ;;  %s3798_s1 = inlined_call_operand.vmem [shape: s32[600,1], index: 1, kind: input, shape index: {}]   ;;  %s3799_s2 = inlined_call_operand.hbm [shape: s32[600,256], index: 2, kind: output, shape index: {0}]   ;;  %s3800_s3 = inlined_call_operand.hbm [shape: s32[600,256], index: 3, kind: output, shape index: {1}]  }
   0x1   :  { %11 = vsyncpa [#allocation3 + $0x1], 0 }
   0x2   :  { %12 = vsyncpa [#allocation4], 0 }
   0x3   :  { %14 = vsyncpa [#allocation4 + $0x1], 0 }
   0x4   :  { %15 = vsyncpa [#allocation7], 0 }
   0x5   :  { %17 = vsyncpa [#allocation7 + $0x1], 0  ;;  %s1917_s12 = smov 0   ;;  %s1919_s13 = smov 0  }
   0x6   :  { %s1921_s14 = smov 0   ;;  %s1923_s15 = smov 0  }
   0x7 LB: > { %s1938_s16 = sadd.s32 4294967295, %s1884_s15   ;;  %s1629_s17 = sadd.s32 4294967294, %s1884_s15   ;;  %s1884_s15 = sphi %s1923_s15, %s3884_s15   ;;  %s1880_s14 = sphi %s1921_s14, %s3883_s14   ;;  %s1876_s13 = sphi %s1919_s13, %s3882_s13   ;;  %s1872_s12 = sphi %s1917_s12, %s3881_s12  }
   0x8   : > { %s1942_s18 = sadd.s32 1, %s1884_s15   ;;  %s30_s19 = sadd.s32 1, %s1880_s14 }
   0x9   : > { %s27_s20 = ssub.s32 %s1884_s15, %s1942_s18  ;;  %p37_p0 = scmp.ne.s32.totalorder %s1880_s14, %s1876_s13 }
   0xa   : > { %p28_p1 = scmp.eq.s32.totalorder %s27_s20, 0  ;;  %p38_p2 = scmp.eq.s32.totalorder %s1884_s15, 0 }
   0xb   : > { %p43_p3 = scmp.ne.s32.totalorder %s1876_s13, %s1872_s12  ;;  %p44_p4 = scmp.eq.s32.totalorder %s1938_s16, 0 }
   0xc   : > { %s1954_s21 = scalar_select %p28_p1, %s1880_s14, %s30_s19  }
   0xd   : > { %p39_p5 = por %p38_p2, %p37_p0  ;;  %p1956_p6 = por %p44_p4, %p43_p3 }
   0xe   : > { %p93_p7 = scmp.eq.s32.totalorder %s1938_s16, 1  ;;  %p99_p8 = scmp.eq.s32.totalorder %s1629_s17, 1 }
   0xf   : > { %p3801_p11 = scmp.ge.s32.totalorder %s1884_s15, 2 }
  0x10   : > { %p1961_p9 = por %p93_p7, %p37_p0  ;;  %p1965_p10 = por %p99_p8, %p43_p3 }
  0x11   : > { %141 = sbr.rel (%p3801_p11) target bundleno = 60 (0x3c), region = 16 }
  0x16   : > { %144 = sbr.rel (!%p39_p5) target bundleno = 60 (0x3c), region = 20  ;;  %s145_s25 = sand.u32 (%p39_p5), 1, %s1880_s14  }
  0x17   : > { %s150_s26 = smul.u32 (%p39_p5), 38, %s1884_s15  ;;  %s1977_s5 = scalar_lea.sflag (%p39_p5), [#allocation3], %s145_s25 }
  0x18   : > { %s1669_s27 = smul.u32 (%p39_p5), 608, %s145_s25 }
  0x19   : > { %s151_s28 = ssub.s32 (%p39_p5), 75, %s150_s26 }
  0x1a   : > { %p152_p12 = scmp.lt.s32.totalorder (%p39_p5), %s151_s28, 38  ;;  %s149_s6 = scalar_lea.vmem (%p39_p5), [#allocation2], %s1669_s27 }
  0x1c   : > { %s3886_s28 = smov (!%p152_p12, %s151_s28), 38 }
  0x1d   : > { %s1657_s29 = sshll.u32 %s3886_s28, 4 }
  0x1e   : > { %s156_s30 = ssub.s32 608, %s1657_s29 }
  0x1f   : > { %s157_s4 = sshll.u32 %s156_s30, 4 }
  0x20   : > { %158 = vsyncadd %s1977_s5, %s157_s4  ;;  %p1980_p13 = scmp.ne.s32.totalorder %s1657_s29, 0  ;;  %s1666_s8 = smul.u32 608, %s1884_s15 }
  0x21   : > { %s1985_s9 = sshll.u32 %s149_s6, 4  ;;  %s1638_s10 = sshll.u32 %s3886_s28, 8  ;;  %s167_s9 = int_to_ptr.vmem [resolvable:$true] %s1985_s9 }
  0x22   : > { %s162_s19 = scalar_lea.hbm %s3797_s0, %s1666_s8  ;;  %s1727_s26 = sshrl.u32 %s1638_s10, 4 }
  0x23   : > { %s164_s20 = sshll.u32 %s162_s19, 4  ;;  %s1736_s4 = scalar_lea.hbm %s3797_s0, 1200  ;;  %s1992_s20 = int_to_ptr.hbm [resolvable:$true] %s164_s20 }
  0x24   : > { %s1725_s25 = sshra.s32 %s1992_s20, 4  ;;  %s1726_s25 = int_to_ptr.hbm [resolvable:$true] %s1725_s25 }
  0x25   : > { %s1732_s27 = scalar_lea.hbm %s1726_s25, %s1727_s26  ;;  %p1737_p3 = scmp.lt.s32.totalorder %s1726_s25, %s3797_s0 }
  0x26   : > { %p1733_p0 = scmp.ne.s32.totalorder %s1726_s25, %s1732_s27  ;;  %p1738_p4 = scmp.lt.s32.totalorder %s1736_s4, %s1732_s27 }
  0x28   : > { %p1734_p1 = pnand %p1733_p0, %p1980_p13  ;;  %p1739_p5 = por %p1738_p4, %p1737_p3 }
  0x2a   : > { %p1735_p2 = pneg %p1734_p1 }
  0x2c   : > { %p1740_p7 = pnand %p1739_p5, %p1735_p2 }
  0x2e   : > { %1743 = shalt.err (!%p1740_p7)
}
  0x2f   : > { %s1744_s11 = sshra.s32 %s167_s9, 4  ;;  %s1886_s19 = smov [#allocation2]   ;;  %s1745_s11 = int_to_ptr.vmem [resolvable:$true] %s1744_s11 }
  0x30   : > { %s1751_s17 = scalar_lea.vmem %s1745_s11, %s1727_s26  ;;  %s1755_s29 = scalar_lea.vmem %s1886_s19, 1216 }
  0x31   : > { %p1752_p8 = scmp.ne.s32.totalorder %s1745_s11, %s1751_s17  ;;  %p1757_p1 = scmp.lt.s32.totalorder %s1755_s29, %s1751_s17 }
  0x33   : > { %p1753_p12 = pnand %p1752_p8, %p1980_p13 }
  0x35   : > { %p1754_p0 = pneg %p1753_p12 }
  0x37   : > { %p1759_p11 = pnand %p1757_p1, %p1754_p0 }
  0x39   : > { %1762 = shalt.err (!%p1759_p11)
}
  0x3a   : > { %s1887_s25 = smov 256   ;;  %s1888_s27 = smov 16  }
  0x3b   : > { %172 = dma.hbm_to_vmem [thread:$0]  (%p1980_p13), %s1992_s20, %s1638_s10, %s167_s9, %s1977_s5, %s1887_s25, %s1887_s25, %s1888_s27  }
  0x3c PF: > { %p1639_p2 = scmp.ge.s32.totalorder %s1884_s15, 1  ;;  %p191_p3 = scmp.lt.s32.totalorder %s1884_s15, 3 }
  0x3e   : > { %p192_p4 = pnand %p1639_p2, %p191_p3 }
  0x40   : > { %195 = sbr.rel (%p192_p4) target bundleno = 602 (0x25a), region = 28 }
  0x45   : > { %s2020_s26 = sand.u32 1, %s1876_s13  }
  0x46   : > { %s2023_s30 = smul.u32 608, %s2020_s26  ;;  %s198_s7 = scalar_lea.sflag [#allocation3], %s2020_s26 }
  0x48   : > { %s2027_s28 = scalar_lea.vmem [#allocation2], %s2023_s30 }
  0x49   : > { %1859 = dma.done.wait (%p1956_p6), %s198_s7, 9728  }
  0x4a   : > { %1861 = vsyncadd (%p1956_p6), %s198_s7, 4294957568  ;;  %v434_v0 = vld [vmem:[%s2027_s28 + $0x40] sm:$0xff]  ;;  %s1889_s5 = smov 1   ;;  %v436_v3 = vld [vmem:[%s2027_s28 + $0x50] sm:$0xff]  ;;  %s2217_s22 = smul.u32 38, %s1938_s16 }
  0x4b   : > { %v430_v1 = vld [vmem:[%s2027_s28 + $0x20] sm:$0xff]  ;;  %510 = vrot.lane.b32.xlu2 %v434_v0, %s1889_s5  ;;  %v432_v4 = vld [vmem:[%s2027_s28 + $0x30] sm:$0xff]  ;;  %v427_v38 = vld [vmem:[%s2027_s28 + $0x8] sm:$0xff]  ;;  %s2496_s8 = scalar_lea.vmem [#allocation6], %s2023_s30  ;;  %s2502_s11 = scalar_lea.vmem [#allocation5], %s2023_s30 }
  0x4c   : > { %v426_v2 = vld [vmem:[%s2027_s28] sm:$0xff]  ;;  %506 = vrot.lane.b32.xlu1 %v430_v1, %s1889_s5  ;;  %v428_v5 = vld [vmem:[%s2027_s28 + $0x10] sm:$0xff]  ;;  %v431_v41 = vld [vmem:[%s2027_s28 + $0x28] sm:$0xff]  ;;  %p250_p6 = scmp.lt.s32.totalorder %s2217_s22, 74  ;;  %s3822_s17 = scalar_lea.sflag [#allocation4], %s2020_s26 }
  0x4d   : > { %502 = vrot.lane.b32.xlu0 %v426_v2, %s1889_s5  ;;  %v442_v6 = vld [vmem:[%s2027_s28 + $0x80] sm:$0xff]  ;;  %v440_v7 = vld [vmem:[%s2027_s28 + $0x70] sm:$0xff]  ;;  %v433_v42 = vld [vmem:[%s2027_s28 + $0x38] sm:$0xff]  ;;  %s1469_s29 = ssub.s32 (%p1961_p9), 75, %s2217_s22 }
  0x4e   : > { %v438_v8 = vld [vmem:[%s2027_s28 + $0x60] sm:$0xff]  ;;  %v448_v9 = vld [vmem:[%s2027_s28 + $0xb0] sm:$0xff]  ;;  %v429_v43 = vld [vmem:[%s2027_s28 + $0x18] sm:$0xff]  ;;  %s251_s9 = scalar_select %p250_p6, %s2217_s22, 74 }
  0x4f   : > { %v446_v10 = vld [vmem:[%s2027_s28 + $0xa0] sm:$0xff]  ;;  %v444_v11 = vld [vmem:[%s2027_s28 + $0x90] sm:$0xff]  ;;  %v437_v45 = vld [vmem:[%s2027_s28 + $0x58] sm:$0xff]  ;;  %p1470_p11 = scmp.lt.s32.totalorder (%p1961_p9), %s1469_s29, 38 }
  0x50   : > { %v454_v12 = vld [vmem:[%s2027_s28 + $0xe0] sm:$0xff]  ;;  %v452_v13 = vld [vmem:[%s2027_s28 + $0xd0] sm:$0xff]  ;;  %v439_v46 = vld [vmem:[%s2027_s28 + $0x68] sm:$0xff]  ;;  %s1640_s10 = sshll.u32 %s251_s9, 3 }
  0x51   : > { %v450_v14 = vld [vmem:[%s2027_s28 + $0xc0] sm:$0xff]  ;;  %v460_v15 = vld [vmem:[%s2027_s28 + $0x110] sm:$0xff]  ;;  %v435_v47 = vld [vmem:[%s2027_s28 + $0x48] sm:$0xff]  ;;  %s2250_s6 = scalar_lea.vmem %s3798_s1, %s1640_s10 }
  0x52   : > { %v458_v16 = vld [vmem:[%s2027_s28 + $0x100] sm:$0xff]  ;;  %v456_v17 = vld [vmem:[%s2027_s28 + $0xf0] sm:$0xff]  ;;  %v443_v51 = vld [vmem:[%s2027_s28 + $0x88] sm:$0xff] }
  0x53   : > { %512 = vrot.lane.b32.xlu2 %v436_v3, %s1889_s5  ;;  %v466_v18 = vld [vmem:[%s2027_s28 + $0x140] sm:$0xff]  ;;  %v464_v19 = vld [vmem:[%s2027_s28 + $0x130] sm:$0xff]  ;;  %v445_v52 = vld [vmem:[%s2027_s28 + $0x98] sm:$0xff] }
  0x54   : > { %508 = vrot.lane.b32.xlu1 %v432_v4, %s1889_s5  ;;  %v462_v20 = vld [vmem:[%s2027_s28 + $0x120] sm:$0xff]  ;;  %v472_v21 = vld [vmem:[%s2027_s28 + $0x170] sm:$0xff]  ;;  %v441_v53 = vld [vmem:[%s2027_s28 + $0x78] sm:$0xff] }
  0x55   : > { %504 = vrot.lane.b32.xlu0 %v428_v5, %s1889_s5  ;;  %v470_v22 = vld [vmem:[%s2027_s28 + $0x160] sm:$0xff]  ;;  %v468_v23 = vld [vmem:[%s2027_s28 + $0x150] sm:$0xff]  ;;  %v449_v57 = vld [vmem:[%s2027_s28 + $0xb8] sm:$0xff] }
  0x56   : > { %v478_v24 = vld [vmem:[%s2027_s28 + $0x1a0] sm:$0xff]  ;;  %v476_v25 = vld [vmem:[%s2027_s28 + $0x190] sm:$0xff]  ;;  %v451_v58 = vld [vmem:[%s2027_s28 + $0xc8] sm:$0xff] }
  0x57   : > { %v474_v26 = vld [vmem:[%s2027_s28 + $0x180] sm:$0xff]  ;;  %v484_v27 = vld [vmem:[%s2027_s28 + $0x1d0] sm:$0xff]  ;;  %v447_v59 = vld [vmem:[%s2027_s28 + $0xa8] sm:$0xff] }
  0x58   : > { %v482_v28 = vld [vmem:[%s2027_s28 + $0x1c0] sm:$0xff]  ;;  %v480_v29 = vld [vmem:[%s2027_s28 + $0x1b0] sm:$0xff]  ;;  %v455_v63 = vld [vmem:[%s2027_s28 + $0xe8] sm:$0xff] }
  0x59   : > { %v490_v30 = vld [vmem:[%s2027_s28 + $0x200] sm:$0xff]  ;;  %v488_v31 = vld [vmem:[%s2027_s28 + $0x1f0] sm:$0xff]  ;;  %v457_v0 = vld [vmem:[%s2027_s28 + $0xf8] sm:$0xff] }
  0x5a   : > { %v486_v32 = vld [vmem:[%s2027_s28 + $0x1e0] sm:$0xff]  ;;  %v496_v33 = vld [vmem:[%s2027_s28 + $0x230] sm:$0xff]  ;;  %v453_v1 = vld [vmem:[%s2027_s28 + $0xd8] sm:$0xff] }
  0x5b   : > { %518 = vrot.lane.b32.xlu2 %v442_v6, %s1889_s5  ;;  %v494_v34 = vld [vmem:[%s2027_s28 + $0x220] sm:$0xff]  ;;  %v492_v35 = vld [vmem:[%s2027_s28 + $0x210] sm:$0xff]  ;;  %v461_v5 = vld [vmem:[%s2027_s28 + $0x118] sm:$0xff] }
  0x5c   : > { %516 = vrot.lane.b32.xlu1 %v440_v7, %s1889_s5  ;;  %v500_v37 = vld [vmem:[%s2027_s28 + $0x250] sm:$0xff]  ;;  %v498_v39 = vld [vmem:[%s2027_s28 + $0x240] sm:$0xff]  ;;  %v463_v6 = vld [vmem:[%s2027_s28 + $0x128] sm:$0xff] }
  0x5d   : > { %514 = vrot.lane.b32.xlu0 %v438_v8, %s1889_s5  ;;  %v459_v7 = vld [vmem:[%s2027_s28 + $0x108] sm:$0xff] }
  0x63   : > { %524 = vrot.lane.b32.xlu2 %v448_v9, %s1889_s5 }
  0x64   : > { %522 = vrot.lane.b32.xlu1 %v446_v10, %s1889_s5 }
  0x65   : > { %520 = vrot.lane.b32.xlu0 %v444_v11, %s1889_s5  ;;  %v467_v11 = vld [vmem:[%s2027_s28 + $0x148] sm:$0xff] }
  0x6b   : > { %530 = vrot.lane.b32.xlu2 %v454_v12, %s1889_s5  ;;  %v469_v12 = vld [vmem:[%s2027_s28 + $0x158] sm:$0xff] }
  0x6c   : > { %528 = vrot.lane.b32.xlu1 %v452_v13, %s1889_s5  ;;  %v465_v13 = vld [vmem:[%s2027_s28 + $0x138] sm:$0xff] }
  0x6d   : > { %526 = vrot.lane.b32.xlu0 %v450_v14, %s1889_s5 }
  0x73   : > { %536 = vrot.lane.b32.xlu2 %v460_v15, %s1889_s5 }
  0x74   : > { %534 = vrot.lane.b32.xlu1 %v458_v16, %s1889_s5 }
  0x75   : > { %532 = vrot.lane.b32.xlu0 %v456_v17, %s1889_s5  ;;  %v473_v17 = vld [vmem:[%s2027_s28 + $0x178] sm:$0xff] }
  0x7b   : > { %542 = vrot.lane.b32.xlu2 %v466_v18, %s1889_s5  ;;  %v475_v18 = vld [vmem:[%s2027_s28 + $0x188] sm:$0xff] }
  0x7c   : > { %540 = vrot.lane.b32.xlu1 %v464_v19, %s1889_s5  ;;  %v471_v19 = vld [vmem:[%s2027_s28 + $0x168] sm:$0xff] }
  0x7d   : > { %538 = vrot.lane.b32.xlu0 %v462_v20, %s1889_s5 }
  0x83   : > { %548 = vrot.lane.b32.xlu2 %v472_v21, %s1889_s5 }
  0x84   : > { %546 = vrot.lane.b32.xlu1 %v470_v22, %s1889_s5 }
  0x85   : > { %544 = vrot.lane.b32.xlu0 %v468_v23, %s1889_s5  ;;  %v3802_v23 = vmov 0  }
  0x86   : > { %1723 = vset.pattern.permute.xlu2 %v3802_v23  ;;  %1722 = vset.pattern.permute.xlu1 %v3802_v23 }
  0x87   : > { %1724 = vset.pattern.permute.xlu0 %v3802_v23 }
  0x8b   : > { %554 = vrot.lane.b32.xlu2 %v478_v24, %s1889_s5  ;;  %v479_v24 = vld [vmem:[%s2027_s28 + $0x1a8] sm:$0xff] }
  0x8c   : > { %552 = vrot.lane.b32.xlu1 %v476_v25, %s1889_s5  ;;  %v481_v25 = vld [vmem:[%s2027_s28 + $0x1b8] sm:$0xff] }
  0x8d   : > { %550 = vrot.lane.b32.xlu0 %v474_v26, %s1889_s5  ;;  %v477_v26 = vld [vmem:[%s2027_s28 + $0x198] sm:$0xff] }
  0x93   : > { %560 = vrot.lane.b32.xlu2 %v484_v27, %s1889_s5 }
  0x94   : > { %558 = vrot.lane.b32.xlu1 %v482_v28, %s1889_s5 }
  0x95   : > { %556 = vrot.lane.b32.xlu0 %v480_v29, %s1889_s5 }
  0x9b   : > { %566 = vrot.lane.b32.xlu2 %v490_v30, %s1889_s5  ;;  %v485_v30 = vld [vmem:[%s2027_s28 + $0x1d8] sm:$0xff] }
  0x9c   : > { %564 = vrot.lane.b32.xlu1 %v488_v31, %s1889_s5  ;;  %v487_v31 = vld [vmem:[%s2027_s28 + $0x1e8] sm:$0xff] }
  0x9d   : > { %562 = vrot.lane.b32.xlu0 %v486_v32, %s1889_s5  ;;  %v483_v32 = vld [vmem:[%s2027_s28 + $0x1c8] sm:$0xff] }
  0xa3   : > { %572 = vrot.lane.b32.xlu2 %v496_v33, %s1889_s5  ;;  %v271_v33 = vlaneseq }
  0xa4   : > { %570 = vrot.lane.b32.xlu1 %v494_v34, %s1889_s5 }
  0xa5   : > { %568 = vrot.lane.b32.xlu0 %v492_v35, %s1889_s5  ;;  %v2105_v36 = vpop.permute.xlu2 %510 }
  0xab   : > { %578 = vrot.lane.b32.xlu2 %v427_v38, %s1889_s5  ;;  %v2239_v38 = vand.u32 127, %v271_v33  ;;  %v280_v33 = vld [vmem:[%s2250_s6 + $0x30] sm:$0xff] }
  0xac   : > { %576 = vrot.lane.b32.xlu1 %v500_v37, %s1889_s5  ;;  %vm324_vm6 = vcmp.lt.s32.totalorder %v280_v33, 254 }
  0xad   : > { %574 = vrot.lane.b32.xlu0 %v498_v39, %s1889_s5  ;;  %v2113_v40 = vpop.permute.xlu2 %512  ;;  %v491_v39 = vld [vmem:[%s2027_s28 + $0x208] sm:$0xff]  ;;  %vm654_vm0 = vcmp.lt.s32.totalorder %v2239_v38, 1 }
  0xb3   : > { %584 = vrot.lane.b32.xlu2 %v433_v42, %s1889_s5  ;;  %v489_v42 = vld [vmem:[%s2027_s28 + $0x1f8] sm:$0xff] }
  0xb4   : > { %582 = vrot.lane.b32.xlu1 %v431_v41, %s1889_s5  ;;  %v493_v41 = vld [vmem:[%s2027_s28 + $0x218] sm:$0xff] }
  0xb5   : > { %580 = vrot.lane.b32.xlu0 %v429_v43, %s1889_s5  ;;  %v2121_v44 = vpop.permute.xlu2 %518 }
  0xbb   : > { %590 = vrot.lane.b32.xlu2 %v439_v46, %s1889_s5 }
  0xbc   : > { %588 = vrot.lane.b32.xlu1 %v437_v45, %s1889_s5 }
  0xbd   : > { %586 = vrot.lane.b32.xlu0 %v435_v47, %s1889_s5  ;;  %v2129_v48 = vpop.permute.xlu2 %524 }
  0xbe   : > { %v2131_v49 = vpop.permute.xlu1 %506 }
  0xbf   : > { %v2133_v50 = vpop.permute.xlu0 %502 }
  0xc3   : > { %596 = vrot.lane.b32.xlu2 %v445_v52, %s1889_s5  ;;  %v275_v52 = vld [vmem:[%s2250_s6 + $0x8] sm:$0xff] }
  0xc4   : > { %594 = vrot.lane.b32.xlu1 %v443_v51, %s1889_s5  ;;  %vm314_vm1 = vcmp.lt.s32.totalorder %v275_v52, 254 }
  0xc5   : > { %592 = vrot.lane.b32.xlu0 %v441_v53, %s1889_s5  ;;  %v2141_v54 = vpop.permute.xlu2 %530  ;;  %v274_v53 = vld [vmem:[%s2250_s6] sm:$0xff] }
  0xc6   : > { %v2143_v55 = vpop.permute.xlu1 %508  ;;  %vm312_vm2 = vcmp.lt.s32.totalorder %v274_v53, 254 }
  0xc7   : > { %v2145_v56 = vpop.permute.xlu0 %504 }
  0xcb   : > { %602 = vrot.lane.b32.xlu2 %v451_v58, %s1889_s5  ;;  %v499_v58 = vld [vmem:[%s2027_s28 + $0x248] sm:$0xff] }
  0xcc   : > { %600 = vrot.lane.b32.xlu1 %v449_v57, %s1889_s5  ;;  %v497_v57 = vld [vmem:[%s2027_s28 + $0x238] sm:$0xff] }
  0xcd   : > { %598 = vrot.lane.b32.xlu0 %v447_v59, %s1889_s5  ;;  %v2153_v60 = vpop.permute.xlu2 %536  ;;  %v495_v59 = vld [vmem:[%s2027_s28 + $0x228] sm:$0xff] }
  0xce   : > { %v2155_v61 = vpop.permute.xlu1 %516 }
  0xcf   : > { %v2157_v62 = vpop.permute.xlu0 %514 }
  0xd3   : > { %608 = vrot.lane.b32.xlu2 %v457_v0, %s1889_s5 }
  0xd4   : > { %606 = vrot.lane.b32.xlu1 %v455_v63, %s1889_s5  ;;  %v313_v63 = vsel %vm312_vm2, %v274_v53, 254  ;;  %v325_v53 = vsel %vm324_vm6, %v280_v33, 254 }
  0xd5   : > { %604 = vrot.lane.b32.xlu0 %v453_v1, %s1889_s5  ;;  %v2165_v2 = vpop.permute.xlu2 %542 }
  0xd6   : > { %3827 = vst [vmem:[#allocation11_spill] sm:$0xff] %v2165_v2  ;;  %v2167_v3 = vpop.permute.xlu1 %522 }
  0xd7   : > { %v2169_v4 = vpop.permute.xlu0 %520 }
  0xdb   : > { %614 = vrot.lane.b32.xlu2 %v463_v6, %s1889_s5  ;;  %v278_v6 = vld [vmem:[%s2250_s6 + $0x20] sm:$0xff] }
  0xdc   : > { %612 = vrot.lane.b32.xlu1 %v461_v5, %s1889_s5  ;;  %vm320_vm3 = vcmp.lt.s32.totalorder %v278_v6, 254 }
  0xdd   : > { %610 = vrot.lane.b32.xlu0 %v459_v7, %s1889_s5  ;;  %v2177_v8 = vpop.permute.xlu2 %548  ;;  %v277_v7 = vld [vmem:[%s2250_s6 + $0x18] sm:$0xff] }
  0xde   : > { %3828 = vst [vmem:[#allocation12_spill] sm:$0xff] %v2177_v8  ;;  %v2179_v9 = vpop.permute.xlu1 %528  ;;  %vm318_vm4 = vcmp.lt.s32.totalorder %v277_v7, 254 }
  0xdf   : > { %v2181_v10 = vpop.permute.xlu0 %526 }
  0xe3   : > { %620 = vrot.lane.b32.xlu2 %v469_v12, %s1889_s5  ;;  %v388_v12 = vadd.s32 1, %v313_v63 }
  0xe4   : > { %618 = vrot.lane.b32.xlu1 %v467_v11, %s1889_s5 }
  0xe5   : > { %616 = vrot.lane.b32.xlu0 %v465_v13, %s1889_s5  ;;  %v2189_v14 = vpop.permute.xlu2 %554  ;;  %v276_v13 = vld [vmem:[%s2250_s6 + $0x10] sm:$0xff] }
  0xe6   : > { %3829 = vst [vmem:[#allocation13_spill] sm:$0xff] %v2189_v14  ;;  %v2191_v15 = vpop.permute.xlu1 %534  ;;  %vm316_vm5 = vcmp.lt.s32.totalorder %v276_v13, 254 }
  0xe7   : > { %v2193_v16 = vpop.permute.xlu0 %532 }
  0xeb   : > { %626 = vrot.lane.b32.xlu2 %v475_v18, %s1889_s5  ;;  %v321_v18 = vsel %vm320_vm3, %v278_v6, 254 }
  0xec   : > { %624 = vrot.lane.b32.xlu1 %v473_v17, %s1889_s5  ;;  %v501_v17 = vld [vmem:[%s2027_s28 + $0x258] sm:$0xff] }
  0xed   : > { %622 = vrot.lane.b32.xlu0 %v471_v19, %s1889_s5  ;;  %v2201_v20 = vpop.permute.xlu2 %560  ;;  %v319_v19 = vsel %vm318_vm4, %v277_v7, 254  ;;  %v283_v7 = vld [vmem:[%s2250_s6 + $0x48] sm:$0xff] }
  0xee   : > { %3830 = vst [vmem:[#allocation14_spill] sm:$0xff] %v2201_v20  ;;  %v2203_v21 = vpop.permute.xlu1 %540  ;;  %vm330_vm9 = vcmp.lt.s32.totalorder %v283_v7, 254 }
  0xef   : > { %v2205_v22 = vpop.permute.xlu0 %538 }
  0xf3   : > { %632 = vrot.lane.b32.xlu2 %v481_v25, %s1889_s5 }
  0xf4   : > { %630 = vrot.lane.b32.xlu1 %v479_v24, %s1889_s5 }
  0xf5   : > { %628 = vrot.lane.b32.xlu0 %v477_v26, %s1889_s5  ;;  %v2219_v27 = vpop.permute.xlu2 %566  ;;  %v317_v26 = vsel %vm316_vm5, %v276_v13, 254 }
  0xf6   : > { %3831 = vst [vmem:[#allocation15_spill] sm:$0xff] %v2219_v27  ;;  %v2221_v28 = vpop.permute.xlu1 %546 }
  0xf7   : > { %v2223_v29 = vpop.permute.xlu0 %544 }
  0xfb   : > { %638 = vrot.lane.b32.xlu2 %v487_v31, %s1889_s5 }
  0xfc   : > { %636 = vrot.lane.b32.xlu1 %v485_v30, %s1889_s5 }
  0xfd   : > { %634 = vrot.lane.b32.xlu0 %v483_v32, %s1889_s5  ;;  %v2233_v34 = vpop.permute.xlu2 %572 }
  0xfe   : > { %3832 = vst [vmem:[#allocation16_spill] sm:$0xff] %v2233_v34  ;;  %v2235_v35 = vpop.permute.xlu1 %552 }
  0xff   : > { %3833 = vst [vmem:[#allocation17_spill] sm:$0xff] %v2235_v35  ;;  %v2237_v37 = vpop.permute.xlu0 %550 }
 0x103   : > { %644 = vrot.lane.b32.xlu2 %v493_v41, %s1889_s5  ;;  %v392_v41 = vadd.s32 1, %v321_v18 }
 0x104   : > { %642 = vrot.lane.b32.xlu1 %v491_v39, %s1889_s5  ;;  %v279_v39 = vld [vmem:[%s2250_s6 + $0x28] sm:$0xff] }
 0x105   : > { %640 = vrot.lane.b32.xlu0 %v489_v42, %s1889_s5  ;;  %v579_v45 = vpop.permute.xlu2 %578  ;;  %v391_v42 = vadd.s32 1, %v319_v19  ;;  %vm322_vm7 = vcmp.lt.s32.totalorder %v279_v39, 254  ;;  %v331_v19 = vsel %vm330_vm9, %v283_v7, 254 }
 0x106   : > { %v2253_v43 = vpop.permute.xlu1 %558  ;;  %v2258_v46 = vsel %vm654_vm0, %v2133_v50, %v579_v45  ;;  %v2263_v47 = vsel %vm654_vm0, %v579_v45, %v2133_v50  ;;  %v315_v50 = vsel %vm314_vm1, %v275_v52, 254  ;;  %v281_v45 = vld [vmem:[%s2250_s6 + $0x38] sm:$0xff]  ;;  %v390_v52 = vadd.s32 1, %v317_v26 }
 0x107   : > { %3834 = vst [vmem:[#allocation18_spill] sm:$0xff] %v2253_v43  ;;  %v2265_v51 = vpop.permute.xlu0 %556  ;;  %v389_v11 = vadd.s32 1, %v315_v50  ;;  %vm326_vm8 = vcmp.lt.s32.totalorder %v281_v45, 254 }
 0x10b   : > { %650 = vrot.lane.b32.xlu2 %v499_v58, %s1889_s5 }
 0x10c   : > { %648 = vrot.lane.b32.xlu1 %v497_v57, %s1889_s5 }
 0x10d   : > { %646 = vrot.lane.b32.xlu0 %v495_v59, %s1889_s5  ;;  %v2277_v1 = vpop.permute.xlu2 %584  ;;  %v327_v59 = vsel %vm326_vm8, %v281_v45, 254  ;;  %v286_v45 = vld [vmem:[%s2250_s6 + $0x60] sm:$0xff] }
 0x10e   : > { %v2275_v0 = vpop.permute.xlu1 %564  ;;  %v395_v18 = vadd.s32 1, %v327_v59  ;;  %vm336_vm12 = vcmp.lt.s32.totalorder %v286_v45, 254 }
 0x10f   : > { %3835 = vst [vmem:[#allocation19_spill] sm:$0xff] %v2275_v0  ;;  %v2279_v5 = vpop.permute.xlu0 %562  ;;  %v337_v7 = vsel %vm336_vm12, %v286_v45, 254 }
 0x113   : > { %735 = vperm.xlu2 %1723, %v389_v11   ;;  %v282_v11 = vld [vmem:[%s2250_s6 + $0x40] sm:$0xff] }
 0x114   : > { %732 = vperm.xlu1 %1722, %v388_v12   ;;  %v394_v12 = vadd.s32 1, %v325_v53  ;;  %vm328_vm10 = vcmp.lt.s32.totalorder %v282_v11, 254  ;;  %v397_v53 = vadd.s32 1, %v331_v19 }
 0x115   : > { %652 = vrot.lane.b32.xlu0 %v501_v17, %s1889_s5  ;;  %v591_v25 = vpop.permute.xlu2 %590  ;;  %v284_v17 = vld [vmem:[%s2250_s6 + $0x50] sm:$0xff] }
 0x116   : > { %v2286_v24 = vpop.permute.xlu1 %570  ;;  %v2291_v30 = vsel %vm654_vm0, %v2157_v62, %v591_v25  ;;  %v2296_v31 = vsel %vm654_vm0, %v591_v25, %v2157_v62  ;;  %v323_v62 = vsel %vm322_vm7, %v279_v39, 254  ;;  %vm332_vm11 = vcmp.lt.s32.totalorder %v284_v17, 254 }
 0x117   : > { %3836 = vst [vmem:[#allocation20_spill] sm:$0xff] %v2286_v24  ;;  %v2298_v32 = vpop.permute.xlu0 %568  ;;  %v393_v13 = vadd.s32 1, %v323_v62  ;;  %v333_v33 = vsel %vm332_vm11, %v284_v17, 254 }
 0x118   : > { %v398_v59 = vadd.s32 1, %v333_v33  ;;  %v400_v33 = vadd.s32 1, %v337_v7 }
 0x11b   : > { %744 = vperm.xlu2 %1723, %v392_v41  }
 0x11c   : > { %741 = vperm.xlu1 %1722, %v391_v42  }
 0x11d   : > { %738 = vperm.xlu0 %1724, %v390_v52   ;;  %v597_v58 = vpop.permute.xlu2 %596  ;;  %v285_v52 = vld [vmem:[%s2250_s6 + $0x58] sm:$0xff] }
 0x11e   : > { %v2303_v57 = vpop.permute.xlu1 %576  ;;  %v2308_v50 = vsel %vm654_vm0, %v2169_v4, %v597_v58  ;;  %v2313_v63 = vsel %vm654_vm0, %v597_v58, %v2169_v4  ;;  %v329_v4 = vsel %vm328_vm10, %v282_v11, 254  ;;  %v287_v58 = vld [vmem:[%s2250_s6 + $0x68] sm:$0xff]  ;;  %vm334_vm13 = vcmp.lt.s32.totalorder %v285_v52, 254 }
 0x11f   : > { %3837 = vst [vmem:[#allocation21_spill] sm:$0xff] %v2303_v57  ;;  %v2315_v6 = vpop.permute.xlu0 %574  ;;  %v396_v62 = vadd.s32 1, %v329_v4  ;;  %vm338_vm14 = vcmp.lt.s32.totalorder %v287_v58, 254  ;;  %v289_v4 = vld [vmem:[%s2250_s6 + $0x78] sm:$0xff] }
 0x120   : > { %vm342_vm15 = vcmp.lt.s32.totalorder %v289_v4, 254 }
 0x123   : > { %750 = vperm.xlu2 %1723, %v394_v12  }
 0x124   : > { %747 = vperm.xlu1 %1722, %v393_v13   ;;  %v339_v13 = vsel %vm338_vm14, %v287_v58, 254 }
 0x125   : > { %753 = vperm.xlu0 %1724, %v395_v18   ;;  %v603_v26 = vpop.permute.xlu2 %602 }
 0x126   : > { %v2320_v25 = vpop.permute.xlu1 %582  ;;  %v2325_v39 = vsel %vm654_vm0, %v2181_v10, %v603_v26  ;;  %v2330_v41 = vsel %vm654_vm0, %v603_v26, %v2181_v10  ;;  %v335_v10 = vsel %vm334_vm13, %v285_v52, 254  ;;  %v288_v26 = vld [vmem:[%s2250_s6 + $0x70] sm:$0xff]  ;;  %v290_v52 = vld [vmem:[%s2250_s6 + $0x80] sm:$0xff] }
 0x127   : > { %v2332_v42 = vpop.permute.xlu0 %580  ;;  %v399_v45 = vadd.s32 1, %v335_v10  ;;  %vm340_vm1 = vcmp.lt.s32.totalorder %v288_v26, 254  ;;  %vm344_vm2 = vcmp.lt.s32.totalorder %v290_v52, 254 }
 0x12b   : > { %759 = vperm.xlu2 %1723, %v397_v53   ;;  %v401_v53 = vadd.s32 1, %v339_v13 }
 0x12c   : > { %756 = vperm.xlu1 %1722, %v396_v62   ;;  %v343_v62 = vsel %vm342_vm15, %v289_v4, 254 }
 0x12d   : > { %762 = vperm.xlu0 %1724, %v398_v59   ;;  %v609_v12 = vpop.permute.xlu2 %608  ;;  %v403_v4 = vadd.s32 1, %v343_v62 }
 0x12e   : > { %v2337_v11 = vpop.permute.xlu1 %588  ;;  %v2342_v17 = vsel %vm654_vm0, %v2193_v16, %v609_v12  ;;  %v2347_v18 = vsel %vm654_vm0, %v609_v12, %v2193_v16  ;;  %v341_v16 = vsel %vm340_vm1, %v288_v26, 254  ;;  %v345_v12 = vsel %vm344_vm2, %v290_v52, 254 }
 0x12f   : > { %v2349_v19 = vpop.permute.xlu0 %586  ;;  %v402_v26 = vadd.s32 1, %v341_v16  ;;  %v404_v23 = vadd.s32 1, %v345_v12 }
 0x133   : > { %768 = vperm.xlu2 %1723, %v400_v33   ;;  %v292_v33 = vld [vmem:[%s2250_s6 + $0x90] sm:$0xff] }
 0x134   : > { %765 = vperm.xlu1 %1722, %v399_v45   ;;  %v291_v45 = vld [vmem:[%s2250_s6 + $0x88] sm:$0xff]  ;;  %vm348_vm3 = vcmp.lt.s32.totalorder %v292_v33, 254 }
 0x135   : > { %771 = vperm.xlu0 %1724, %v401_v53   ;;  %v615_v59 = vpop.permute.xlu2 %614  ;;  %v293_v53 = vld [vmem:[%s2250_s6 + $0x98] sm:$0xff]  ;;  %vm346_vm4 = vcmp.lt.s32.totalorder %v291_v45, 254  ;;  %v349_v52 = vsel %vm348_vm3, %v292_v33, 254 }
 0x136   : > { %v2354_v58 = vpop.permute.xlu1 %594  ;;  %v2359_v7 = vsel %vm654_vm0, %v2205_v22, %v615_v59  ;;  %v2364_v10 = vsel %vm654_vm0, %v615_v59, %v2205_v22  ;;  %vm350_vm5 = vcmp.lt.s32.totalorder %v293_v53, 254  ;;  %v347_v22 = vsel %vm346_vm4, %v291_v45, 254 }
 0x137   : > { %v2366_v13 = vpop.permute.xlu0 %592  ;;  %v351_v57 = vsel %vm350_vm5, %v293_v53, 254  ;;  %v406_v33 = vadd.s32 1, %v349_v52  ;;  %v405_v45 = vadd.s32 1, %v347_v22 }
 0x138   : > { %v407_v27 = vadd.s32 1, %v351_v57 }
 0x13b   : > { %777 = vperm.xlu2 %1723, %v403_v4   ;;  %v295_v4 = vld [vmem:[%s2250_s6 + $0xa8] sm:$0xff] }
 0x13c   : > { %774 = vperm.xlu1 %1722, %v402_v26   ;;  %v296_v26 = vld [vmem:[%s2250_s6 + $0xb0] sm:$0xff]  ;;  %vm354_vm6 = vcmp.lt.s32.totalorder %v295_v4, 254 }
 0x13d   : > { %780 = vperm.xlu0 %1724, %v404_v23   ;;  %v621_v34 = vpop.permute.xlu2 %620  ;;  %v294_v23 = vld [vmem:[%s2250_s6 + $0xa0] sm:$0xff]  ;;  %vm356_vm8 = vcmp.lt.s32.totalorder %v296_v26, 254  ;;  %v355_v53 = vsel %vm354_vm6, %v295_v4, 254 }
 0x13e   : > { %v2371_v59 = vpop.permute.xlu1 %600  ;;  %v2376_v62 = vsel %vm654_vm0, %v2223_v29, %v621_v34  ;;  %v2381_v16 = vsel %vm654_vm0, %v621_v34, %v2223_v29  ;;  %vm352_vm7 = vcmp.lt.s32.totalorder %v294_v23, 254  ;;  %v357_v20 = vsel %vm356_vm8, %v296_v26, 254 }
 0x13f   : > { %v2383_v12 = vpop.permute.xlu0 %598  ;;  %v353_v29 = vsel %vm352_vm7, %v294_v23, 254  ;;  %v409_v4 = vadd.s32 1, %v355_v53  ;;  %v410_v0 = vadd.s32 1, %v357_v20 }
 0x140   : > { %v408_v23 = vadd.s32 1, %v353_v29 }
 0x143   : > { %786 = vperm.xlu2 %1723, %v406_v33   ;;  %v298_v33 = vld [vmem:[%s2250_s6 + $0xc0] sm:$0xff] }
 0x144   : > { %783 = vperm.xlu1 %1722, %v405_v45   ;;  %v299_v45 = vld [vmem:[%s2250_s6 + $0xc8] sm:$0xff]  ;;  %vm360_vm9 = vcmp.lt.s32.totalorder %v298_v33, 254 }
 0x145   : > { %789 = vperm.xlu0 %1724, %v407_v27   ;;  %v627_v24 = vpop.permute.xlu2 %626  ;;  %v297_v27 = vld [vmem:[%s2250_s6 + $0xb8] sm:$0xff]  ;;  %vm362_vm11 = vcmp.lt.s32.totalorder %v299_v45, 254  ;;  %v361_v26 = vsel %vm360_vm9, %v298_v33, 254  ;;  %vm1149_vm9 = vcmp.eq.s32.totalorder %v2239_v38, 0 }
 0x146   : > { %v2388_v34 = vpop.permute.xlu1 %606  ;;  %v2393_v52 = vsel %vm654_vm0, %v2237_v37, %v627_v24  ;;  %v2398_v57 = vsel %vm654_vm0, %v627_v24, %v2237_v37  ;;  %vm358_vm10 = vcmp.lt.s32.totalorder %v297_v27, 254  ;;  %v363_v43 = vsel %vm362_vm11, %v299_v45, 254 }
 0x147   : > { %v2400_v22 = vpop.permute.xlu0 %604  ;;  %v359_v37 = vsel %vm358_vm10, %v297_v27, 254  ;;  %v412_v33 = vadd.s32 1, %v361_v26  ;;  %v413_v8 = vadd.s32 1, %v363_v43 }
 0x148   : > { %v411_v27 = vadd.s32 1, %v359_v37 }
 0x14b   : > { %795 = vperm.xlu2 %1723, %v409_v4   ;;  %v301_v4 = vld [vmem:[%s2250_s6 + $0xd8] sm:$0xff] }
 0x14c   : > { %792 = vperm.xlu1 %1722, %v408_v23   ;;  %v302_v23 = vld [vmem:[%s2250_s6 + $0xe0] sm:$0xff]  ;;  %vm366_vm12 = vcmp.lt.s32.totalorder %v301_v4, 254 }
 0x14d   : > { %798 = vperm.xlu0 %1724, %v410_v0   ;;  %v633_v14 = vpop.permute.xlu2 %632  ;;  %v300_v0 = vld [vmem:[%s2250_s6 + $0xd0] sm:$0xff]  ;;  %vm368_vm14 = vcmp.lt.s32.totalorder %v302_v23, 254  ;;  %v367_v45 = vsel %vm366_vm12, %v301_v4, 254 }
 0x14e   : > { %v2405_v24 = vpop.permute.xlu1 %612  ;;  %v2410_v53 = vsel %vm654_vm0, %v2265_v51, %v633_v14  ;;  %v2415_v20 = vsel %vm654_vm0, %v633_v14, %v2265_v51  ;;  %vm364_vm13 = vcmp.lt.s32.totalorder %v300_v0, 254  ;;  %v369_v2 = vsel %vm368_vm14, %v302_v23, 254 }
 0x14f   : > { %v2417_v29 = vpop.permute.xlu0 %610  ;;  %v365_v14 = vsel %vm364_vm13, %v300_v0, 254  ;;  %v415_v4 = vadd.s32 1, %v367_v45 }
 0x150   : > { %v414_v0 = vadd.s32 1, %v365_v14 }
 0x153   : > { %804 = vperm.xlu2 %1723, %v412_v33   ;;  %v304_v33 = vld [vmem:[%s2250_s6 + $0xf0] sm:$0xff] }
 0x154   : > { %801 = vperm.xlu1 %1722, %v411_v27   ;;  %v305_v27 = vld [vmem:[%s2250_s6 + $0xf8] sm:$0xff]  ;;  %vm372_vm15 = vcmp.lt.s32.totalorder %v304_v33, 254 }
 0x155   : > { %807 = vperm.xlu0 %1724, %v413_v8   ;;  %v639_v35 = vpop.permute.xlu2 %638  ;;  %v303_v8 = vld [vmem:[%s2250_s6 + $0xe8] sm:$0xff]  ;;  %vm374_vm2 = vcmp.lt.s32.totalorder %v305_v27, 254  ;;  %v373_v23 = vsel %vm372_vm15, %v304_v33, 254 }
 0x156   : > { %v2422_v51 = vpop.permute.xlu1 %618  ;;  %v2427_v26 = vsel %vm654_vm0, %v2279_v5, %v639_v35  ;;  %v2432_v43 = vsel %vm654_vm0, %v639_v35, %v2279_v5  ;;  %vm370_vm1 = vcmp.lt.s32.totalorder %v303_v8, 254  ;;  %v418_v33 = vadd.s32 1, %v373_v23 }
 0x157   : > { %3838 = vst [vmem:[#allocation22_spill] sm:$0xff] %v2422_v51  ;;  %v2434_v37 = vpop.permute.xlu0 %616  ;;  %v416_v51 = vadd.s32 1, %v369_v2  ;;  %v371_v35 = vsel %vm370_vm1, %v303_v8, 254 }
 0x158   : > { %3839 = vst [vmem:[#allocation23_spill] sm:$0xff] %v2427_v26  ;;  %v417_v8 = vadd.s32 1, %v371_v35 }
 0x159   : > { %3840 = vst [vmem:[#allocation24_spill] sm:$0xff] %v2432_v43  ;;  %v375_v43 = vsel %vm374_vm2, %v305_v27, 254 }
 0x15b   : > { %813 = vperm.xlu2 %1723, %v415_v4   ;;  %v307_v4 = vld [vmem:[%s2250_s6 + $0x108] sm:$0xff] }
 0x15c   : > { %810 = vperm.xlu1 %1722, %v414_v0   ;;  %v308_v0 = vld [vmem:[%s2250_s6 + $0x110] sm:$0xff]  ;;  %vm378_vm3 = vcmp.lt.s32.totalorder %v307_v4, 254 }
 0x15d   : > { %816 = vperm.xlu0 %1724, %v416_v51   ;;  %v645_v26 = vpop.permute.xlu2 %644  ;;  %v306_v51 = vld [vmem:[%s2250_s6 + $0x100] sm:$0xff]  ;;  %vm380_vm5 = vcmp.lt.s32.totalorder %v308_v0, 254  ;;  %v379_v27 = vsel %vm378_vm3, %v307_v4, 254 }
 0x15e   : > { %v2439_v5 = vpop.permute.xlu1 %624  ;;  %v2444_v45 = vsel %vm654_vm0, %v2298_v32, %v645_v26  ;;  %v2449_v2 = vsel %vm654_vm0, %v645_v26, %v2298_v32  ;;  %vm376_vm4 = vcmp.lt.s32.totalorder %v306_v51, 254  ;;  %v421_v4 = vadd.s32 1, %v379_v27 }
 0x15f   : > { %3841 = vst [vmem:[#allocation25_spill] sm:$0xff] %v2439_v5  ;;  %v2451_v14 = vpop.permute.xlu0 %622  ;;  %v419_v5 = vadd.s32 1, %v375_v43  ;;  %v377_v32 = vsel %vm376_vm4, %v306_v51, 254 }
 0x160   : > { %3842 = vst [vmem:[#allocation26_spill] sm:$0xff] %v2444_v45  ;;  %v420_v51 = vadd.s32 1, %v377_v32 }
 0x161   : > { %3843 = vst [vmem:[#allocation27_spill] sm:$0xff] %v2449_v2  ;;  %v381_v2 = vsel %vm380_vm5, %v308_v0, 254  ;;  %v2474_v0 = vadd.s32 128, %v2239_v38 }
 0x163   : > { %822 = vperm.xlu2 %1723, %v418_v33   ;;  %v310_v33 = vld [vmem:[%s2250_s6 + $0x120] sm:$0xff] }
 0x164   : > { %819 = vperm.xlu1 %1722, %v417_v8   ;;  %v311_v8 = vld [vmem:[%s2250_s6 + $0x128] sm:$0xff]  ;;  %vm384_vm6 = vcmp.lt.s32.totalorder %v310_v33, 254 }
 0x165   : > { %825 = vperm.xlu0 %1724, %v419_v5   ;;  %v651_v45 = vpop.permute.xlu2 %650  ;;  %v309_v5 = vld [vmem:[%s2250_s6 + $0x118] sm:$0xff]  ;;  %vm386_vm8 = vcmp.lt.s32.totalorder %v311_v8, 254 }
 0x166   : > { %v2456_v26 = vpop.permute.xlu1 %630  ;;  %v2461_v23 = vsel %vm654_vm0, %v2315_v6, %v651_v45  ;;  %v2466_v43 = vsel %vm654_vm0, %v651_v45, %v2315_v6  ;;  %vm382_vm7 = vcmp.lt.s32.totalorder %v309_v5, 254  ;;  %v656_v45 = vsel %vm654_vm0, %v2145_v56, %v2332_v42 }
 0x167   : > { %3844 = vst [vmem:[#allocation28_spill] sm:$0xff] %v2456_v26  ;;  %v2468_v35 = vpop.permute.xlu0 %628  ;;  %v422_v26 = vadd.s32 1, %v381_v2  ;;  %v383_v6 = vsel %vm382_vm7, %v309_v5, 254  ;;  %v387_v2 = vsel %vm386_vm8, %v311_v8, 254  ;;  %v3850_v8 = vmov 0  }
 0x168   : > { %3845 = vst [vmem:[#allocation29_spill] sm:$0xff] %v2461_v23  ;;  %v385_v23 = vsel %vm384_vm6, %v310_v33, 254 }
 0x169   : > { %3846 = vst [vmem:[#allocation30_spill] sm:$0xff] %v2466_v43  ;;  %v694_v43 = vsel %vm654_vm0, %v2332_v42, %v2145_v56  ;;  %v424_v5 = vadd.s32 1, %v385_v23  ;;  %v425_v42 = vadd.s32 1, %v387_v2 }
 0x16a   : > { %3847 = vst [vmem:[#allocation31_spill] sm:$0xff] %v2468_v35 }
 0x16b   : > { %831 = vperm.xlu2 %1723, %v421_v4  }
 0x16c   : > { %828 = vperm.xlu1 %1722, %v420_v51   ;;  %v423_v51 = vadd.s32 1, %v383_v6 }
 0x16d   : > { %834 = vperm.xlu0 %1724, %v422_v26   ;;  %v736_v32 = vpop.permute.xlu2 %735 }
 0x16e   : > { %v2480_v27 = vpop.permute.xlu1 %636  ;;  %vm847_vm10 = vcmp.le.s32.totalorder %v2239_v38, %v736_v32  ;;  %vm848_vm11 = vcmp.le.s32.totalorder %v2474_v0, %v736_v32  ;;  %vm999_vm12 = vcmp.eq.s32.totalorder %v2239_v38, %v736_v32  ;;  %vm1000_vm13 = vcmp.eq.s32.totalorder %v2474_v0, %v736_v32 }
 0x16f   : > { %3848 = vst [vmem:[#allocation32_spill] sm:$0xff] %v2480_v27  ;;  %v2486_v4 = vpop.permute.xlu0 %634  ;;  %v923_v26 = vsel %vm847_vm10, %v694_v43, 0  ;;  %v924_v33 = vsel %vm848_vm11, %v656_v45, 0  ;;  %v1305_v56 = vsel %vm847_vm10, 1, %v3850_v8  ;;  %v1306_v35 = vsel %vm848_vm11, 1, %v3850_v8 }
 0x170   : > { %3849 = vst [vmem:[#allocation33_spill] sm:$0xff] %v2486_v4  ;;  %v1075_v27 = vsel %vm999_vm12, 102, %v923_v26  ;;  %v1076_v4 = vsel %vm1000_vm13, 102, %v924_v33  ;;  %v659_v45 = vsel %vm654_vm0, %v2105_v36, %v2349_v19 }
 0x171   : > { %1381 = vst [vmem:[%s2496_s8 + $0x10] sm:$0xff] %v1305_v56  ;;  %v1153_v23 = vsel %vm1149_vm9, 101, %v1075_v27  ;;  %v697_v27 = vsel %vm654_vm0, %v2349_v19, %v2105_v36 }
 0x172   : > { %1230 = vst [vmem:[%s2502_s11 + $0x18] sm:$0xff] %v1076_v4 }
 0x173   : > { %1229 = vst [vmem:[%s2502_s11 + $0x10] sm:$0xff] %v1153_v23  ;;  %840 = vperm.xlu2 %1723, %v424_v5  }
 0x174   : > { %837 = vperm.xlu1 %1722, %v423_v51   ;;  %1382 = vst [vmem:[%s2496_s8 + $0x18] sm:$0xff] %v1306_v35 }
 0x175   : > { %843 = vperm.xlu0 %1724, %v425_v42   ;;  %v745_v6 = vpop.permute.xlu2 %744 }
 0x176   : > { %v2507_v43 = vpop.permute.xlu1 %642  ;;  %vm853_vm14 = vcmp.le.s32.totalorder %v2239_v38, %v745_v6  ;;  %vm854_vm15 = vcmp.le.s32.totalorder %v2474_v0, %v745_v6  ;;  %vm1005_vm1 = vcmp.eq.s32.totalorder %v2239_v38, %v745_v6  ;;  %vm1006_vm2 = vcmp.eq.s32.totalorder %v2474_v0, %v745_v6 }
 0x177   : > { %v2517_v32 = vpop.permute.xlu0 %640  ;;  %v929_v35 = vsel %vm853_vm14, %v697_v27, 0  ;;  %v930_v2 = vsel %vm854_vm15, %v659_v45, 0  ;;  %v1311_v4 = vsel %vm853_vm14, 1, %v3850_v8  ;;  %v1312_v5 = vsel %vm854_vm15, 1, %v3850_v8 }
 0x178   : > { %v1081_v26 = vsel %vm1005_vm1, 102, %v929_v35  ;;  %v1082_v33 = vsel %vm1006_vm2, 102, %v930_v2  ;;  %1387 = vst [vmem:[%s2496_s8 + $0x40] sm:$0xff] %v1311_v4 }
 0x179   : > { %v1159_v36 = vsel %vm1149_vm9, 101, %v1081_v26  ;;  %1236 = vst [vmem:[%s2502_s11 + $0x48] sm:$0xff] %v1082_v33 }
 0x17a   : > { %1235 = vst [vmem:[%s2502_s11 + $0x40] sm:$0xff] %v1159_v36 }
 0x17b   : > { %1388 = vst [vmem:[%s2496_s8 + $0x48] sm:$0xff] %v1312_v5 }
 0x17d   : > { %v751_v51 = vpop.permute.xlu2 %750 }
 0x17e   : > { %v2531_v19 = vpop.permute.xlu1 %648  ;;  %vm857_vm3 = vcmp.le.s32.totalorder %v2239_v38, %v751_v51  ;;  %vm858_vm4 = vcmp.le.s32.totalorder %v2474_v0, %v751_v51  ;;  %vm1009_vm5 = vcmp.eq.s32.totalorder %v2239_v38, %v751_v51  ;;  %vm1010_vm6 = vcmp.eq.s32.totalorder %v2474_v0, %v751_v51 }
 0x17f   : > { %v2533_v56 = vpop.permute.xlu0 %646  ;;  %v933_v42 = vsel %vm857_vm3, %v2296_v31, 0  ;;  %v934_v23 = vsel %vm858_vm4, %v2291_v30, 0  ;;  %v1315_v6 = vsel %vm857_vm3, 1, %v3850_v8  ;;  %v1316_v35 = vsel %vm858_vm4, 1, %v3850_v8 }
 0x180   : > { %v1085_v45 = vsel %vm1009_vm5, 102, %v933_v42  ;;  %v1086_v27 = vsel %vm1010_vm6, 102, %v934_v23  ;;  %1391 = vst [vmem:[%s2496_s8 + $0x60] sm:$0xff] %v1315_v6 }
 0x181   : > { %v1163_v2 = vsel %vm1149_vm9, 101, %v1085_v45  ;;  %1240 = vst [vmem:[%s2502_s11 + $0x68] sm:$0xff] %v1086_v27 }
 0x182   : > { %1239 = vst [vmem:[%s2502_s11 + $0x60] sm:$0xff] %v1163_v2  ;;  %v695_v2 = vsel %vm654_vm0, %v2320_v25, %v2131_v49 }
 0x183   : > { %1392 = vst [vmem:[%s2496_s8 + $0x68] sm:$0xff] %v1316_v35 }
 0x185   : > { %v760_v31 = vpop.permute.xlu2 %759 }
 0x186   : > { %v733_v30 = vpop.permute.xlu1 %732  ;;  %vm863_vm7 = vcmp.le.s32.totalorder %v2239_v38, %v760_v31  ;;  %vm864_vm8 = vcmp.le.s32.totalorder %v2474_v0, %v760_v31  ;;  %vm1015_vm10 = vcmp.eq.s32.totalorder %v2239_v38, %v760_v31  ;;  %vm1016_vm11 = vcmp.eq.s32.totalorder %v2474_v0, %v760_v31 }
 0x187   : > { %v2549_v4 = vpop.permute.xlu0 %652  ;;  %v939_v26 = vsel %vm863_vm7, %v2313_v63, 0  ;;  %v940_v33 = vsel %vm864_vm8, %v2308_v50, 0  ;;  %v1321_v51 = vsel %vm863_vm7, 1, %v3850_v8  ;;  %v1322_v42 = vsel %vm864_vm8, 1, %v3850_v8 }
 0x188   : > { %v1091_v5 = vsel %vm1015_vm10, 102, %v939_v26  ;;  %v1092_v36 = vsel %vm1016_vm11, 102, %v940_v33  ;;  %vm845_vm12 = vcmp.le.s32.totalorder %v2239_v38, %v733_v30  ;;  %vm846_vm13 = vcmp.le.s32.totalorder %v2474_v0, %v733_v30  ;;  %1397 = vst [vmem:[%s2496_s8 + $0x90] sm:$0xff] %v1321_v51 }
 0x189   : > { %v1169_v23 = vsel %vm1149_vm9, 101, %v1091_v5  ;;  %1246 = vst [vmem:[%s2502_s11 + $0x98] sm:$0xff] %v1092_v36  ;;  %vm997_vm14 = vcmp.eq.s32.totalorder %v2239_v38, %v733_v30  ;;  %v921_v50 = vsel %vm845_vm12, %v2263_v47, 0  ;;  %v922_v63 = vsel %vm846_vm13, %v2258_v46, 0 }
 0x18a   : > { %1245 = vst [vmem:[%s2502_s11 + $0x90] sm:$0xff] %v1169_v23  ;;  %vm998_vm15 = vcmp.eq.s32.totalorder %v2474_v0, %v733_v30  ;;  %v1073_v6 = vsel %vm997_vm14, 102, %v921_v50  ;;  %v1303_v35 = vsel %vm845_vm12, 1, %v3850_v8  ;;  %v658_v47 = vsel %vm654_vm0, %v2143_v55, %v2277_v1 }
 0x18b   : > { %v1074_v45 = vsel %vm998_vm15, 102, %v922_v63  ;;  %1398 = vst [vmem:[%s2496_s8 + $0x98] sm:$0xff] %v1322_v42  ;;  %v1151_v27 = vsel %vm1149_vm9, 101, %v1073_v6  ;;  %v657_v46 = vsel %vm654_vm0, %v2131_v49, %v2320_v25  ;;  %v1304_v31 = vsel %vm846_vm13, 1, %v3850_v8 }
 0x18c   : > { %1227 = vst [vmem:[%s2502_s11] sm:$0xff] %v1151_v27  ;;  %v696_v63 = vsel %vm654_vm0, %v2277_v1, %v2143_v55 }
 0x18d   : > { %v769_v26 = vpop.permute.xlu2 %768  ;;  %1228 = vst [vmem:[%s2502_s11 + $0x8] sm:$0xff] %v1074_v45 }
 0x18e   : > { %vm869_vm1 = vcmp.le.s32.totalorder %v2239_v38, %v769_v26  ;;  %vm870_vm2 = vcmp.le.s32.totalorder %v2474_v0, %v769_v26  ;;  %vm1021_vm3 = vcmp.eq.s32.totalorder %v2239_v38, %v769_v26  ;;  %vm1022_vm4 = vcmp.eq.s32.totalorder %v2474_v0, %v769_v26  ;;  %v742_v5 = vpop.permute.xlu1 %741  ;;  %1379 = vst [vmem:[%s2496_s8] sm:$0xff] %v1303_v35 }
 0x18f   : > { %v739_v33 = vpop.permute.xlu0 %738  ;;  %1380 = vst [vmem:[%s2496_s8 + $0x8] sm:$0xff] %v1304_v31  ;;  %v945_v23 = vsel %vm869_vm1, %v2330_v41, 0  ;;  %v946_v50 = vsel %vm870_vm2, %v2325_v39, 0  ;;  %v1327_v55 = vsel %vm869_vm1, 1, %v3850_v8  ;;  %vm851_vm10 = vcmp.le.s32.totalorder %v2239_v38, %v742_v5 }
 0x190   : > { %vm849_vm5 = vcmp.le.s32.totalorder %v2239_v38, %v739_v33  ;;  %vm850_vm6 = vcmp.le.s32.totalorder %v2474_v0, %v739_v33  ;;  %vm1001_vm7 = vcmp.eq.s32.totalorder %v2239_v38, %v739_v33  ;;  %vm1002_vm8 = vcmp.eq.s32.totalorder %v2474_v0, %v739_v33  ;;  %1403 = vst [vmem:[%s2496_s8 + $0xc0] sm:$0xff] %v1327_v55 }
 0x191   : > { %v925_v49 = vsel %vm849_vm5, %v695_v2, 0  ;;  %v926_v25 = vsel %vm850_vm6, %v657_v46, 0  ;;  %v1307_v30 = vsel %vm849_vm5, 1, %v3850_v8  ;;  %v1308_v36 = vsel %vm850_vm6, 1, %v3850_v8 }
 0x192   : > { %v1077_v51 = vsel %vm1001_vm7, 102, %v925_v49  ;;  %v1078_v42 = vsel %vm1002_vm8, 102, %v926_v25  ;;  %1383 = vst [vmem:[%s2496_s8 + $0x20] sm:$0xff] %v1307_v30  ;;  %v1097_v45 = vsel %vm1021_vm3, 102, %v945_v23  ;;  %v1098_v41 = vsel %vm1022_vm4, 102, %v946_v50 }
 0x193   : > { %v1155_v6 = vsel %vm1149_vm9, 101, %v1077_v51  ;;  %1232 = vst [vmem:[%s2502_s11 + $0x28] sm:$0xff] %v1078_v42  ;;  %v1175_v39 = vsel %vm1149_vm9, 101, %v1097_v45  ;;  %vm852_vm11 = vcmp.le.s32.totalorder %v2474_v0, %v742_v5  ;;  %v927_v1 = vsel %vm851_vm10, %v696_v63, 0 }
 0x194   : > { %1231 = vst [vmem:[%s2502_s11 + $0x20] sm:$0xff] %v1155_v6  ;;  %v928_v27 = vsel %vm852_vm11, %v658_v47, 0  ;;  %vm1003_vm12 = vcmp.eq.s32.totalorder %v2239_v38, %v742_v5  ;;  %vm1004_vm13 = vcmp.eq.s32.totalorder %v2474_v0, %v742_v5  ;;  %v662_v35 = vsel %vm654_vm0, %v2155_v61, %v2366_v13 }
 0x195   : > { %1384 = vst [vmem:[%s2496_s8 + $0x28] sm:$0xff] %v1308_v36  ;;  %v1328_v46 = vsel %vm870_vm2, 1, %v3850_v8  ;;  %v1079_v2 = vsel %vm1003_vm12, 102, %v927_v1  ;;  %v778_v31 = vpop.permute.xlu2 %777  ;;  %v700_v47 = vsel %vm654_vm0, %v2366_v13, %v2155_v61  ;;  %v1080_v33 = vsel %vm1004_vm13, 102, %v928_v27 }
 0x196   : > { %1251 = vst [vmem:[%s2502_s11 + $0xc0] sm:$0xff] %v1175_v39  ;;  %v1157_v49 = vsel %vm1149_vm9, 101, %v1079_v2  ;;  %vm875_vm14 = vcmp.le.s32.totalorder %v2239_v38, %v778_v31  ;;  %v1309_v26 = vsel %vm851_vm10, 1, %v3850_v8  ;;  %vm1027_vm4 = vcmp.eq.s32.totalorder %v2239_v38, %v778_v31  ;;  %v748_v30 = vpop.permute.xlu1 %747 }
 0x197   : > { %1252 = vst [vmem:[%s2502_s11 + $0xc8] sm:$0xff] %v1098_v41  ;;  %v754_v25 = vpop.permute.xlu0 %753  ;;  %v1310_v36 = vsel %vm852_vm11, 1, %v3850_v8  ;;  %vm876_vm5 = vcmp.le.s32.totalorder %v2474_v0, %v778_v31  ;;  %v951_v42 = vsel %vm875_vm14, %v2347_v18, 0  ;;  %v698_v23 = vsel %vm654_vm0, %v2337_v11, %v2113_v40 }
 0x198   : > { %vm859_vm15 = vcmp.le.s32.totalorder %v2239_v38, %v754_v25  ;;  %vm860_vm1 = vcmp.le.s32.totalorder %v2474_v0, %v754_v25  ;;  %vm1011_vm2 = vcmp.eq.s32.totalorder %v2239_v38, %v754_v25  ;;  %1404 = vst [vmem:[%s2496_s8 + $0xc8] sm:$0xff] %v1328_v46  ;;  %vm1012_vm3 = vcmp.eq.s32.totalorder %v2474_v0, %v754_v25 }
 0x199   : > { %v935_v61 = vsel %vm859_vm15, %v700_v47, 0  ;;  %v936_v13 = vsel %vm860_vm1, %v662_v35, 0  ;;  %1233 = vst [vmem:[%s2502_s11 + $0x30] sm:$0xff] %v1157_v49  ;;  %v1317_v63 = vsel %vm859_vm15, 1, %v3850_v8  ;;  %v1103_v6 = vsel %vm1027_vm4, 102, %v951_v42 }
 0x19a   : > { %v1087_v51 = vsel %vm1011_vm2, 102, %v935_v61  ;;  %1234 = vst [vmem:[%s2502_s11 + $0x38] sm:$0xff] %v1080_v33  ;;  %v1088_v5 = vsel %vm1012_vm3, 102, %v936_v13  ;;  %vm855_vm6 = vcmp.le.s32.totalorder %v2239_v38, %v748_v30  ;;  %v952_v18 = vsel %vm876_vm5, %v2342_v17, 0 }
 0x19b   : > { %v1165_v50 = vsel %vm1149_vm9, 101, %v1087_v51  ;;  %1385 = vst [vmem:[%s2496_s8 + $0x30] sm:$0xff] %v1309_v26  ;;  %vm1028_vm7 = vcmp.eq.s32.totalorder %v2474_v0, %v778_v31  ;;  %v931_v45 = vsel %vm855_vm6, %v698_v23, 0  ;;  %vm1007_vm8 = vcmp.eq.s32.totalorder %v2239_v38, %v748_v30 }
 0x19c   : > { %1386 = vst [vmem:[%s2496_s8 + $0x38] sm:$0xff] %v1310_v36  ;;  %v1318_v41 = vsel %vm860_vm1, 1, %v3850_v8  ;;  %vm856_vm10 = vcmp.le.s32.totalorder %v2474_v0, %v748_v30  ;;  %v660_v17 = vsel %vm654_vm0, %v2113_v40, %v2337_v11  ;;  %v703_v39 = vsel %vm654_vm0, %v2383_v12, %v2167_v3 }
 0x19d   : > { %1241 = vst [vmem:[%s2502_s11 + $0x70] sm:$0xff] %v1165_v50  ;;  %v1181_v55 = vsel %vm1149_vm9, 101, %v1103_v6  ;;  %v2712_v27 = vpop.permute.xlu2 %786  ;;  %v1104_v35 = vsel %vm1028_vm7, 102, %v952_v18  ;;  %v1333_v40 = vsel %vm875_vm14, 1, %v3850_v8  ;;  %v1083_v11 = vsel %vm1007_vm8, 102, %v931_v45 }
 0x19e   : > { %1242 = vst [vmem:[%s2502_s11 + $0x78] sm:$0xff] %v1088_v5  ;;  %v932_v46 = vsel %vm856_vm10, %v660_v17, 0  ;;  %vm1008_vm12 = vcmp.eq.s32.totalorder %v2474_v0, %v748_v30  ;;  %v1334_v47 = vsel %vm876_vm5, 1, %v3850_v8  ;;  %vm881_vm15 = vcmp.le.s32.totalorder %v2239_v38, %v2712_v27  ;;  %v2736_v49 = vpop.permute.xlu1 %756 }
 0x19f   : > { %v763_v1 = vpop.permute.xlu0 %762  ;;  %1393 = vst [vmem:[%s2496_s8 + $0x70] sm:$0xff] %v1317_v63  ;;  %v1161_v33 = vsel %vm1149_vm9, 101, %v1083_v11  ;;  %v665_v25 = vsel %vm654_vm0, %v2167_v3, %v2383_v12  ;;  %v1084_v31 = vsel %vm1008_vm12, 102, %v932_v46  ;;  %v1313_v26 = vsel %vm855_vm6, 1, %v3850_v8 }
 0x1a0   : > { %vm865_vm11 = vcmp.le.s32.totalorder %v2239_v38, %v763_v1  ;;  %1394 = vst [vmem:[%s2496_s8 + $0x78] sm:$0xff] %v1318_v41  ;;  %vm1017_vm13 = vcmp.eq.s32.totalorder %v2239_v38, %v763_v1  ;;  %vm866_vm14 = vcmp.le.s32.totalorder %v2474_v0, %v763_v1  ;;  %vm1018_vm1 = vcmp.eq.s32.totalorder %v2474_v0, %v763_v1 }
 0x1a1   : > { %v941_v2 = vsel %vm865_vm11, %v703_v39, 0  ;;  %1257 = vst [vmem:[%s2502_s11 + $0xf0] sm:$0xff] %v1181_v55  ;;  %v942_v13 = vsel %vm866_vm14, %v665_v25, 0  ;;  %v957_v3 = vsel %vm881_vm15, %v2364_v10, 0  ;;  %vm1033_vm2 = vcmp.eq.s32.totalorder %v2239_v38, %v2712_v27 }
 0x1a2   : > { %1258 = vst [vmem:[%s2502_s11 + $0xf8] sm:$0xff] %v1104_v35  ;;  %v1093_v61 = vsel %vm1017_vm13, 102, %v941_v2  ;;  %v1314_v12 = vsel %vm856_vm10, 1, %v3850_v8  ;;  %vm882_vm3 = vcmp.le.s32.totalorder %v2474_v0, %v2712_v27  ;;  %vm861_vm4 = vcmp.le.s32.totalorder %v2239_v38, %v2736_v49 }
 0x1a3   : > { %1409 = vst [vmem:[%s2496_s8 + $0xf0] sm:$0xff] %v1333_v40  ;;  %v1171_v36 = vsel %vm1149_vm9, 101, %v1093_v61  ;;  %v701_v30 = vsel %vm654_vm0, %v2354_v58, %v2121_v44  ;;  %v1094_v51 = vsel %vm1018_vm1, 102, %v942_v13  ;;  %v1323_v42 = vsel %vm865_vm11, 1, %v3850_v8 }
 0x1a4   : > { %1410 = vst [vmem:[%s2496_s8 + $0xf8] sm:$0xff] %v1334_v47  ;;  %v1109_v23 = vsel %vm1033_vm2, 102, %v957_v3  ;;  %v958_v50 = vsel %vm882_vm3, %v2359_v7, 0  ;;  %vm1034_vm5 = vcmp.eq.s32.totalorder %v2474_v0, %v2712_v27  ;;  %v937_v5 = vsel %vm861_vm4, %v701_v30, 0 }
 0x1a5   : > { %1237 = vst [vmem:[%s2502_s11 + $0x50] sm:$0xff] %v1161_v33  ;;  %vm1013_vm6 = vcmp.eq.s32.totalorder %v2239_v38, %v2736_v49  ;;  %v1324_v63 = vsel %vm866_vm14, 1, %v3850_v8  ;;  %vm862_vm7 = vcmp.le.s32.totalorder %v2474_v0, %v2736_v49  ;;  %v663_v7 = vsel %vm654_vm0, %v2121_v44, %v2354_v58  ;;  %v2804_v18 = vpop.permute.xlu2 %795 }
 0x1a6   : > { %1238 = vst [vmem:[%s2502_s11 + $0x58] sm:$0xff] %v1084_v31  ;;  %v1187_v6 = vsel %vm1149_vm9, 101, %v1109_v23  ;;  %v706_v45 = vsel %vm654_vm0, %v2400_v22, %v2179_v9  ;;  %v1110_v41 = vsel %vm1034_vm5, 102, %v958_v50  ;;  %v1339_v44 = vsel %vm881_vm15, 1, %v3850_v8  ;;  %v2838_v35 = vpop.permute.xlu1 %765 }
 0x1a7   : > { %v2767_v10 = vpop.permute.xlu0 %771  ;;  %1389 = vst [vmem:[%s2496_s8 + $0x50] sm:$0xff] %v1313_v26  ;;  %v1089_v58 = vsel %vm1013_vm6, 102, %v937_v5  ;;  %v938_v17 = vsel %vm862_vm7, %v663_v7, 0  ;;  %vm1014_vm10 = vcmp.eq.s32.totalorder %v2474_v0, %v2736_v49  ;;  %v1340_v55 = vsel %vm882_vm3, 1, %v3850_v8 }
 0x1a8   : > { %1390 = vst [vmem:[%s2496_s8 + $0x58] sm:$0xff] %v1314_v12  ;;  %vm871_vm8 = vcmp.le.s32.totalorder %v2239_v38, %v2767_v10  ;;  %vm1023_vm11 = vcmp.eq.s32.totalorder %v2239_v38, %v2767_v10  ;;  %vm872_vm12 = vcmp.le.s32.totalorder %v2474_v0, %v2767_v10  ;;  %vm887_vm13 = vcmp.le.s32.totalorder %v2239_v38, %v2804_v18 }
 0x1a9   : > { %1247 = vst [vmem:[%s2502_s11 + $0xa0] sm:$0xff] %v1171_v36  ;;  %v947_v39 = vsel %vm871_vm8, %v706_v45, 0  ;;  %v1167_v1 = vsel %vm1149_vm9, 101, %v1089_v58  ;;  %v668_v27 = vsel %vm654_vm0, %v2179_v9, %v2400_v22  ;;  %v1090_v40 = vsel %vm1014_vm10, 102, %v938_v17 }
 0x1aa   : > { %1248 = vst [vmem:[%s2502_s11 + $0xa8] sm:$0xff] %v1094_v51  ;;  %v1319_v11 = vsel %vm861_vm4, 1, %v3850_v8  ;;  %v1099_v46 = vsel %vm1023_vm11, 102, %v947_v39  ;;  %v948_v2 = vsel %vm872_vm12, %v668_v27, 0  ;;  %vm1024_vm14 = vcmp.eq.s32.totalorder %v2474_v0, %v2767_v10 }
 0x1ab   : > { %1399 = vst [vmem:[%s2496_s8 + $0xa0] sm:$0xff] %v1323_v42  ;;  %v963_v9 = vsel %vm887_vm13, %v2381_v16, 0  ;;  %vm1039_vm15 = vcmp.eq.s32.totalorder %v2239_v38, %v2804_v18  ;;  %v1320_v22 = vsel %vm862_vm7, 1, %v3850_v8  ;;  %vm888_vm1 = vcmp.le.s32.totalorder %v2474_v0, %v2804_v18 }
 0x1ac   : > { %1400 = vst [vmem:[%s2496_s8 + $0xa8] sm:$0xff] %v1324_v63  ;;  %vm867_vm2 = vcmp.le.s32.totalorder %v2239_v38, %v2838_v35  ;;  %v1177_v16 = vsel %vm1149_vm9, 101, %v1099_v46  ;;  %v704_v33 = vsel %vm654_vm0, %v2371_v59, %v2129_v48  ;;  %v1100_v49 = vsel %vm1024_vm14, 102, %v948_v2 }
 0x1ad   : > { %1263 = vst [vmem:[%s2502_s11 + $0x120] sm:$0xff] %v1187_v6  ;;  %v1329_v25 = vsel %vm871_vm8, 1, %v3850_v8  ;;  %v1115_v31 = vsel %vm1039_vm15, 102, %v963_v9  ;;  %v964_v26 = vsel %vm888_vm1, %v2376_v62, 0  ;;  %vm1040_vm3 = vcmp.eq.s32.totalorder %v2474_v0, %v2804_v18  ;;  %v2912_v12 = vpop.permute.xlu2 %804 }
 0x1ae   : > { %1264 = vst [vmem:[%s2502_s11 + $0x128] sm:$0xff] %v1110_v41  ;;  %v943_v61 = vsel %vm867_vm2, %v704_v33, 0  ;;  %vm1019_vm4 = vcmp.eq.s32.totalorder %v2239_v38, %v2838_v35  ;;  %v1330_v13 = vsel %vm872_vm12, 1, %v3850_v8  ;;  %vm868_vm5 = vcmp.le.s32.totalorder %v2474_v0, %v2838_v35  ;;  %v2946_v50 = vpop.permute.xlu1 %774 }
 0x1af   : > { %1415 = vst [vmem:[%s2496_s8 + $0x120] sm:$0xff] %v1339_v44  ;;  %v2873_v47 = vpop.permute.xlu0 %780  ;;  %v666_v62 = vsel %vm654_vm0, %v2129_v48, %v2371_v59  ;;  %v1193_v3 = vsel %vm1149_vm9, 101, %v1115_v31  ;;  %v709_v36 = vsel %vm654_vm0, %v2417_v29, %v2191_v15  ;;  %v1116_v10 = vsel %vm1040_vm3, 102, %v964_v26 }
 0x1b0   : > { %1416 = vst [vmem:[%s2496_s8 + $0x128] sm:$0xff] %v1340_v55  ;;  %vm877_vm6 = vcmp.le.s32.totalorder %v2239_v38, %v2873_v47  ;;  %v1345_v48 = vsel %vm887_vm13, 1, %v3850_v8  ;;  %v1095_v59 = vsel %vm1019_vm4, 102, %v943_v61  ;;  %v944_v30 = vsel %vm868_vm5, %v666_v62, 0 }
 0x1b1   : > { %1243 = vst [vmem:[%s2502_s11 + $0x80] sm:$0xff] %v1167_v1  ;;  %vm1020_vm7 = vcmp.eq.s32.totalorder %v2474_v0, %v2838_v35  ;;  %v953_v51 = vsel %vm877_vm6, %v709_v36, 0  ;;  %vm1029_vm8 = vcmp.eq.s32.totalorder %v2239_v38, %v2873_v47  ;;  %v1346_v42 = vsel %vm888_vm1, 1, %v3850_v8 }
 0x1b2   : > { %1244 = vst [vmem:[%s2502_s11 + $0x88] sm:$0xff] %v1090_v40  ;;  %vm878_vm10 = vcmp.le.s32.totalorder %v2474_v0, %v2873_v47  ;;  %vm893_vm11 = vcmp.le.s32.totalorder %v2239_v38, %v2912_v12  ;;  %v1173_v23 = vsel %vm1149_vm9, 101, %v1095_v59  ;;  %v671_v5 = vsel %vm654_vm0, %v2191_v15, %v2417_v29 }
 0x1b3   : > { %1395 = vst [vmem:[%s2496_s8 + $0x80] sm:$0xff] %v1319_v11  ;;  %v1096_v63 = vsel %vm1020_vm7, 102, %v944_v30  ;;  %v1325_v7 = vsel %vm867_vm2, 1, %v3850_v8  ;;  %v1105_v6 = vsel %vm1029_vm8, 102, %v953_v51  ;;  %v954_v18 = vsel %vm878_vm10, %v671_v5, 0 }
 0x1b4   : > { %1396 = vst [vmem:[%s2496_s8 + $0x88] sm:$0xff] %v1320_v22  ;;  %vm1030_vm12 = vcmp.eq.s32.totalorder %v2474_v0, %v2873_v47  ;;  %v969_v15 = vsel %vm893_vm11, %v2398_v57, 0  ;;  %vm1045_vm13 = vcmp.eq.s32.totalorder %v2239_v38, %v2912_v12  ;;  %v1326_v29 = vsel %vm868_vm5, 1, %v3850_v8 }
 0x1b5   : > { %1253 = vst [vmem:[%s2502_s11 + $0xd0] sm:$0xff] %v1177_v16  ;;  %vm894_vm14 = vcmp.le.s32.totalorder %v2474_v0, %v2912_v12  ;;  %vm873_vm15 = vcmp.le.s32.totalorder %v2239_v38, %v2946_v50  ;;  %v1183_v57 = vsel %vm1149_vm9, 101, %v1105_v6  ;;  %v707_v41 = vsel %vm654_vm0, %v2388_v34, %v2141_v54  ;;  %v3020_v27 = vpop.permute.xlu2 %813 }
 0x1b6   : > { %1254 = vst [vmem:[%s2502_s11 + $0xd8] sm:$0xff] %v1100_v49  ;;  %v1106_v44 = vsel %vm1030_vm12, 102, %v954_v18  ;;  %v1335_v58 = vsel %vm877_vm6, 1, %v3850_v8  ;;  %v1121_v17 = vsel %vm1045_vm13, 102, %v969_v15  ;;  %v970_v39 = vsel %vm894_vm14, %v2393_v52, 0  ;;  %v3054_v16 = vpop.permute.xlu1 %783 }
 0x1b7   : > { %1405 = vst [vmem:[%s2496_s8 + $0xd0] sm:$0xff] %v1329_v25  ;;  %v2981_v45 = vpop.permute.xlu0 %789  ;;  %vm1046_vm1 = vcmp.eq.s32.totalorder %v2474_v0, %v2912_v12  ;;  %v949_v55 = vsel %vm873_vm15, %v707_v41, 0  ;;  %vm1025_vm2 = vcmp.eq.s32.totalorder %v2239_v38, %v2946_v50  ;;  %v1336_v1 = vsel %vm878_vm10, 1, %v3850_v8 }
 0x1b8   : > { %1406 = vst [vmem:[%s2496_s8 + $0xd8] sm:$0xff] %v1330_v13  ;;  %vm874_vm3 = vcmp.le.s32.totalorder %v2474_v0, %v2946_v50  ;;  %vm883_vm4 = vcmp.le.s32.totalorder %v2239_v38, %v2981_v45  ;;  %v669_v52 = vsel %vm654_vm0, %v2141_v54, %v2388_v34  ;;  %v1199_v35 = vsel %vm1149_vm9, 101, %v1121_v17 }
 0x1b9   : > { %1269 = vst [vmem:[%s2502_s11 + $0x150] sm:$0xff] %v1193_v3  ;;  %v712_v40 = vsel %vm654_vm0, %v2434_v37, %v2203_v21  ;;  %v1122_v11 = vsel %vm1046_vm1, 102, %v970_v39  ;;  %v1351_v54 = vsel %vm893_vm11, 1, %v3850_v8  ;;  %v1101_v34 = vsel %vm1025_vm2, 102, %v949_v55 }
 0x1ba   : > { %1270 = vst [vmem:[%s2502_s11 + $0x158] sm:$0xff] %v1116_v10  ;;  %v950_v46 = vsel %vm874_vm3, %v669_v52, 0  ;;  %vm1026_vm5 = vcmp.eq.s32.totalorder %v2474_v0, %v2946_v50  ;;  %v959_v2 = vsel %vm883_vm4, %v712_v40, 0  ;;  %vm1035_vm6 = vcmp.eq.s32.totalorder %v2239_v38, %v2981_v45  ;;  %v3854_v52 = vld [vmem:[#allocation23_spill] sm:$0xff] }
 0x1bb   : > { %1421 = vst [vmem:[%s2496_s8 + $0x150] sm:$0xff] %v1345_v48  ;;  %v1352_v9 = vsel %vm894_vm14, 1, %v3850_v8  ;;  %vm884_vm7 = vcmp.le.s32.totalorder %v2474_v0, %v2981_v45  ;;  %vm899_vm8 = vcmp.le.s32.totalorder %v2239_v38, %v3020_v27  ;;  %v1179_v22 = vsel %vm1149_vm9, 101, %v1101_v34 }
 0x1bc   : > { %1422 = vst [vmem:[%s2496_s8 + $0x158] sm:$0xff] %v1346_v42  ;;  %v674_v47 = vsel %vm654_vm0, %v2203_v21, %v2434_v37  ;;  %v1102_v33 = vsel %vm1026_vm5, 102, %v950_v46  ;;  %v1331_v49 = vsel %vm873_vm15, 1, %v3850_v8  ;;  %v1111_v25 = vsel %vm1035_vm6, 102, %v959_v2  ;;  %v3855_v2 = vld [vmem:[#allocation17_spill] sm:$0xff] }
 0x1bd   : > { %1249 = vst [vmem:[%s2502_s11 + $0xb0] sm:$0xff] %v1173_v23  ;;  %v960_v31 = vsel %vm884_vm7, %v674_v47, 0  ;;  %vm1036_vm10 = vcmp.eq.s32.totalorder %v2474_v0, %v2981_v45  ;;  %v975_v21 = vsel %vm899_vm8, %v2415_v20, 0  ;;  %vm1051_vm11 = vcmp.eq.s32.totalorder %v2239_v38, %v3020_v27  ;;  %v3128_v59 = vpop.permute.xlu2 %822 }
 0x1be   : > { %1250 = vst [vmem:[%s2502_s11 + $0xb8] sm:$0xff] %v1096_v63  ;;  %v1332_v37 = vsel %vm874_vm3, 1, %v3850_v8  ;;  %vm900_vm12 = vcmp.le.s32.totalorder %v2474_v0, %v3020_v27  ;;  %vm879_vm13 = vcmp.le.s32.totalorder %v2239_v38, %v3054_v16  ;;  %v1189_v20 = vsel %vm1149_vm9, 101, %v1111_v25  ;;  %v3150_v50 = vpop.permute.xlu1 %792 }
 0x1bf   : > { %1401 = vst [vmem:[%s2496_s8 + $0xb0] sm:$0xff] %v1325_v7  ;;  %v3089_v26 = vpop.permute.xlu0 %798  ;;  %v710_v61 = vsel %vm654_vm0, %v2405_v24, %v2153_v60  ;;  %v1112_v13 = vsel %vm1036_vm10, 102, %v960_v31  ;;  %v1341_v62 = vsel %vm883_vm4, 1, %v3850_v8  ;;  %v1127_v3 = vsel %vm1051_vm11, 102, %v975_v21 }
 0x1c0   : > { %1402 = vst [vmem:[%s2496_s8 + $0xb8] sm:$0xff] %v1326_v29  ;;  %v976_v12 = vsel %vm900_vm12, %v2410_v53, 0  ;;  %vm1052_vm14 = vcmp.eq.s32.totalorder %v2474_v0, %v3020_v27  ;;  %v955_v36 = vsel %vm879_vm13, %v710_v61, 0  ;;  %vm1031_vm15 = vcmp.eq.s32.totalorder %v2239_v38, %v3054_v16 }
 0x1c1   : > { %1259 = vst [vmem:[%s2502_s11 + $0x100] sm:$0xff] %v1183_v57  ;;  %v1342_v10 = vsel %vm884_vm7, 1, %v3850_v8  ;;  %vm880_vm1 = vcmp.le.s32.totalorder %v2474_v0, %v3054_v16  ;;  %vm889_vm2 = vcmp.le.s32.totalorder %v2239_v38, %v3089_v26  ;;  %v672_v53 = vsel %vm654_vm0, %v2153_v60, %v2405_v24  ;;  %v3851_v57 = vld [vmem:[#allocation24_spill] sm:$0xff] }
 0x1c2   : > { %1260 = vst [vmem:[%s2502_s11 + $0x108] sm:$0xff] %v1106_v44  ;;  %v1205_v48 = vsel %vm1149_vm9, 101, %v1127_v3  ;;  %v715_v30 = vsel %vm654_vm0, %v2451_v14, %v2221_v28  ;;  %v1128_v51 = vsel %vm1052_vm14, 102, %v976_v12  ;;  %v1357_v60 = vsel %vm899_vm8, 1, %v3850_v8  ;;  %v3852_v44 = vld [vmem:[#allocation11_spill] sm:$0xff] }
 0x1c3   : > { %1411 = vst [vmem:[%s2496_s8 + $0x100] sm:$0xff] %v1335_v58  ;;  %v1107_v24 = vsel %vm1031_vm15, 102, %v955_v36  ;;  %v956_v42 = vsel %vm880_vm1, %v672_v53, 0  ;;  %vm1032_vm3 = vcmp.eq.s32.totalorder %v2474_v0, %v3054_v16  ;;  %v965_v23 = vsel %vm889_vm2, %v715_v30, 0  ;;  %v3853_v58 = vld [vmem:[#allocation22_spill] sm:$0xff]  ;;  %v3858_v53 = vld [vmem:[#allocation12_spill] sm:$0xff] }
 0x1c4   : > { %1412 = vst [vmem:[%s2496_s8 + $0x108] sm:$0xff] %v1336_v1  ;;  %vm1041_vm4 = vcmp.eq.s32.totalorder %v2239_v38, %v3089_v26  ;;  %v1358_v5 = vsel %vm900_vm12, 1, %v3850_v8  ;;  %vm890_vm5 = vcmp.le.s32.totalorder %v2474_v0, %v3089_v26  ;;  %vm905_vm6 = vcmp.le.s32.totalorder %v2239_v38, %v3128_v59 }
 0x1c5   : > { %1275 = vst [vmem:[%s2502_s11 + $0x180] sm:$0xff] %v1199_v35  ;;  %v1185_v63 = vsel %vm1149_vm9, 101, %v1107_v24  ;;  %v677_v7 = vsel %vm654_vm0, %v2221_v28, %v2451_v14  ;;  %v1108_v6 = vsel %vm1032_vm3, 102, %v956_v42  ;;  %v1337_v18 = vsel %vm879_vm13, 1, %v3850_v8  ;;  %v3236_v34 = vpop.permute.xlu2 %831  ;;  %v3860_v24 = vld [vmem:[#allocation26_spill] sm:$0xff] }
 0x1c6   : > { %1276 = vst [vmem:[%s2502_s11 + $0x188] sm:$0xff] %v1122_v11  ;;  %v1117_v15 = vsel %vm1041_vm4, 102, %v965_v23  ;;  %v966_v29 = vsel %vm890_vm5, %v677_v7, 0  ;;  %vm1042_vm7 = vcmp.eq.s32.totalorder %v2474_v0, %v3089_v26  ;;  %v981_v28 = vsel %vm905_vm6, %v3851_v57, 0  ;;  %v3238_v46 = vpop.permute.xlu1 %801 }
 0x1c7   : > { %1427 = vst [vmem:[%s2496_s8 + $0x180] sm:$0xff] %v1351_v54  ;;  %vm1057_vm8 = vcmp.eq.s32.totalorder %v2239_v38, %v3128_v59  ;;  %v1338_v14 = vsel %vm880_vm1, 1, %v3850_v8  ;;  %vm906_vm10 = vcmp.le.s32.totalorder %v2474_v0, %v3128_v59  ;;  %vm885_vm11 = vcmp.le.s32.totalorder %v2239_v38, %v3150_v50  ;;  %v3197_v41 = vpop.permute.xlu0 %807 }
 0x1c8   : > { %1428 = vst [vmem:[%s2496_s8 + $0x188] sm:$0xff] %v1352_v9  ;;  %v1195_v45 = vsel %vm1149_vm9, 101, %v1117_v15  ;;  %v713_v17 = vsel %vm654_vm0, %v3853_v58, %v3852_v44  ;;  %v1118_v39 = vsel %vm1042_vm7, 102, %v966_v29  ;;  %v1347_v55 = vsel %vm889_vm2, 1, %v3850_v8  ;;  %v3856_v9 = vld [vmem:[#allocation31_spill] sm:$0xff]  ;;  %v3862_v15 = vld [vmem:[#allocation33_spill] sm:$0xff] }
 0x1c9   : > { %1255 = vst [vmem:[%s2502_s11 + $0xe0] sm:$0xff] %v1179_v22  ;;  %v1133_v1 = vsel %vm1057_vm8, 102, %v981_v28  ;;  %v982_v35 = vsel %vm906_vm10, %v3854_v52, 0  ;;  %vm1058_vm12 = vcmp.eq.s32.totalorder %v2474_v0, %v3128_v59  ;;  %v961_v27 = vsel %vm885_vm11, %v713_v17, 0 }
 0x1ca   : > { %1256 = vst [vmem:[%s2502_s11 + $0xe8] sm:$0xff] %v1102_v33  ;;  %vm1037_vm13 = vcmp.eq.s32.totalorder %v2239_v38, %v3150_v50  ;;  %v1348_v40 = vsel %vm890_vm5, 1, %v3850_v8  ;;  %vm886_vm14 = vcmp.le.s32.totalorder %v2474_v0, %v3150_v50  ;;  %vm895_vm15 = vcmp.le.s32.totalorder %v2239_v38, %v3197_v41 }
 0x1cb   : > { %1407 = vst [vmem:[%s2496_s8 + $0xe0] sm:$0xff] %v1331_v49  ;;  %v675_v11 = vsel %vm654_vm0, %v3852_v44, %v3853_v58  ;;  %v1211_v54 = vsel %vm1149_vm9, 101, %v1133_v1  ;;  %v718_v22 = vsel %vm654_vm0, %v3856_v9, %v3855_v2  ;;  %v1134_v16 = vsel %vm1058_vm12, 102, %v982_v35 }
 0x1cc   : > { %1408 = vst [vmem:[%s2496_s8 + $0xe8] sm:$0xff] %v1332_v37  ;;  %v1363_v47 = vsel %vm905_vm6, 1, %v3850_v8  ;;  %v1113_v33 = vsel %vm1037_vm13, 102, %v961_v27  ;;  %v962_v49 = vsel %vm886_vm14, %v675_v11, 0  ;;  %vm1038_vm1 = vcmp.eq.s32.totalorder %v2474_v0, %v3150_v50  ;;  %v3863_v27 = vld [vmem:[#allocation30_spill] sm:$0xff] }
 0x1cd   : > { %1265 = vst [vmem:[%s2502_s11 + $0x130] sm:$0xff] %v1189_v20  ;;  %v971_v25 = vsel %vm895_vm15, %v718_v22, 0  ;;  %vm1047_vm2 = vcmp.eq.s32.totalorder %v2239_v38, %v3197_v41  ;;  %v1364_v31 = vsel %vm906_vm10, 1, %v3850_v8  ;;  %vm896_vm3 = vcmp.le.s32.totalorder %v2474_v0, %v3197_v41 }
 0x1ce   : > { %1266 = vst [vmem:[%s2502_s11 + $0x138] sm:$0xff] %v1112_v13  ;;  %vm911_vm4 = vcmp.le.s32.totalorder %v2239_v38, %v3236_v34  ;;  %v1191_v21 = vsel %vm1149_vm9, 101, %v1113_v33  ;;  %v680_v37 = vsel %vm654_vm0, %v3855_v2, %v3856_v9  ;;  %v1114_v20 = vsel %vm1038_vm1, 102, %v962_v49  ;;  %v3328_v50 = vpop.permute.xlu1 %810  ;;  %v3864_v2 = vld [vmem:[#allocation13_spill] sm:$0xff]  ;;  %v3865_v9 = vld [vmem:[#allocation28_spill] sm:$0xff] }
 0x1cf   : > { %1417 = vst [vmem:[%s2496_s8 + $0x130] sm:$0xff] %v1341_v62  ;;  %v1343_v26 = vsel %vm885_vm11, 1, %v3850_v8  ;;  %v1123_v61 = vsel %vm1047_vm2, 102, %v971_v25  ;;  %v972_v13 = vsel %vm896_vm3, %v680_v37, 0  ;;  %vm1048_vm5 = vcmp.eq.s32.totalorder %v2474_v0, %v3197_v41  ;;  %v3857_v62 = vld [vmem:[#allocation27_spill] sm:$0xff]  ;;  %v3293_v12 = vpop.permute.xlu0 %816  ;;  %v3866_v33 = vld [vmem:[#allocation29_spill] sm:$0xff] }
 0x1d0   : > { %1418 = vst [vmem:[%s2496_s8 + $0x138] sm:$0xff] %v1342_v10  ;;  %v987_v3 = vsel %vm911_vm4, %v3857_v62, 0  ;;  %vm1063_vm6 = vcmp.eq.s32.totalorder %v2239_v38, %v3236_v34  ;;  %v1344_v36 = vsel %vm886_vm14, 1, %v3850_v8  ;;  %vm912_vm7 = vcmp.le.s32.totalorder %v2474_v0, %v3236_v34 }
 0x1d1   : > { %1281 = vst [vmem:[%s2502_s11 + $0x1b0] sm:$0xff] %v1205_v48  ;;  %vm891_vm8 = vcmp.le.s32.totalorder %v2239_v38, %v3238_v46  ;;  %v1201_v10 = vsel %vm1149_vm9, 101, %v1123_v61  ;;  %v3859_v48 = vld [vmem:[#allocation25_spill] sm:$0xff]  ;;  %v1124_v30 = vsel %vm1048_vm5, 102, %v972_v13  ;;  %v988_v42 = vsel %vm912_vm7, %v3860_v24, 0 }
 0x1d2   : > { %1282 = vst [vmem:[%s2502_s11 + $0x1b8] sm:$0xff] %v1128_v51  ;;  %v716_v59 = vsel %vm654_vm0, %v3859_v48, %v3858_v53  ;;  %v1353_v51 = vsel %vm895_vm15, 1, %v3850_v8  ;;  %vm1064_vm10 = vcmp.eq.s32.totalorder %v2474_v0, %v3236_v34  ;;  %vm1043_vm11 = vcmp.eq.s32.totalorder %v2239_v38, %v3238_v46 }
 0x1d3   : > { %1433 = vst [vmem:[%s2496_s8 + $0x1b0] sm:$0xff] %v1357_v60  ;;  %v1139_v60 = vsel %vm1063_vm6, 102, %v987_v3  ;;  %v967_v23 = vsel %vm891_vm8, %v716_v59, 0  ;;  %vm892_vm12 = vcmp.le.s32.totalorder %v2474_v0, %v3238_v46  ;;  %vm901_vm13 = vcmp.le.s32.totalorder %v2239_v38, %v3293_v12 }
 0x1d4   : > { %1434 = vst [vmem:[%s2496_s8 + $0x1b8] sm:$0xff] %v1358_v5  ;;  %v1354_v5 = vsel %vm896_vm3, 1, %v3850_v8  ;;  %v1217_v7 = vsel %vm1149_vm9, 101, %v1139_v60  ;;  %v1140_v57 = vsel %vm1064_vm10, 102, %v988_v42  ;;  %v1369_v28 = vsel %vm911_vm4, 1, %v3850_v8 }
 0x1d5   : > { %1261 = vst [vmem:[%s2502_s11 + $0x110] sm:$0xff] %v1185_v63  ;;  %v678_v63 = vsel %vm654_vm0, %v3858_v53, %v3859_v48  ;;  %vm1044_vm14 = vcmp.eq.s32.totalorder %v2474_v0, %v3238_v46  ;;  %vm1053_vm15 = vcmp.eq.s32.totalorder %v2239_v38, %v3293_v12  ;;  %v1370_v44 = vsel %vm912_vm7, 1, %v3850_v8  ;;  %v3868_v53 = vld [vmem:[#allocation14_spill] sm:$0xff]  ;;  %v3869_v48 = vld [vmem:[#allocation32_spill] sm:$0xff] }
 0x1d6   : > { %1262 = vst [vmem:[%s2502_s11 + $0x118] sm:$0xff] %v1108_v6  ;;  %v3346_v6 = vpop.permute.xlu2 %840  ;;  %vm902_vm1 = vcmp.le.s32.totalorder %v2474_v0, %v3293_v12  ;;  %v1349_v1 = vsel %vm891_vm8, 1, %v3850_v8  ;;  %vm1054_vm3 = vcmp.eq.s32.totalorder %v2474_v0, %v3293_v12  ;;  %v1350_v11 = vsel %vm892_vm12, 1, %v3850_v8  ;;  %v3415_v34 = vpop.permute.xlu1 %819 }
 0x1d7   : > { %1413 = vst [vmem:[%s2496_s8 + $0x110] sm:$0xff] %v1337_v18  ;;  %v3861_v18 = vld [vmem:[#allocation18_spill] sm:$0xff]  ;;  %vm917_vm2 = vcmp.le.s32.totalorder %v2239_v38, %v3346_v6  ;;  %v3380_v17 = vpop.permute.xlu0 %825  ;;  %vm1069_vm4 = vcmp.eq.s32.totalorder %v2239_v38, %v3346_v6  ;;  %vm918_vm5 = vcmp.le.s32.totalorder %v2474_v0, %v3346_v6  ;;  %vm897_vm6 = vcmp.le.s32.totalorder %v2239_v38, %v3328_v50 }
 0x1d8   : > { %1414 = vst [vmem:[%s2496_s8 + $0x118] sm:$0xff] %v1338_v14  ;;  %v721_v29 = vsel %vm654_vm0, %v3862_v15, %v3861_v18  ;;  %v1119_v14 = vsel %vm1043_vm11, 102, %v967_v23  ;;  %v719_v46 = vsel %vm654_vm0, %v3865_v9, %v3864_v2  ;;  %v994_v49 = vsel %vm918_vm5, %v3866_v33, 0  ;;  %v3873_v33 = vld [vmem:[#allocation16_spill] sm:$0xff] }
 0x1d9   : > { %1271 = vst [vmem:[%s2502_s11 + $0x160] sm:$0xff] %v1195_v45  ;;  %v968_v45 = vsel %vm892_vm12, %v678_v63, 0  ;;  %v977_v41 = vsel %vm901_vm13, %v721_v29, 0  ;;  %v1197_v58 = vsel %vm1149_vm9, 101, %v1119_v14  ;;  %vm1070_vm7 = vcmp.eq.s32.totalorder %v2474_v0, %v3346_v6 }
 0x1da   : > { %1272 = vst [vmem:[%s2502_s11 + $0x168] sm:$0xff] %v1118_v39  ;;  %v683_v39 = vsel %vm654_vm0, %v3861_v18, %v3862_v15  ;;  %v1129_v52 = vsel %vm1053_vm15, 102, %v977_v41  ;;  %v973_v25 = vsel %vm897_vm6, %v719_v46, 0  ;;  %vm1049_vm8 = vcmp.eq.s32.totalorder %v2239_v38, %v3328_v50  ;;  %v3870_v18 = vld [vmem:[#allocation20_spill] sm:$0xff]  ;;  %v3871_v41 = vld [vmem:[#allocation15_spill] sm:$0xff] }
 0x1db   : > { %1423 = vst [vmem:[%s2496_s8 + $0x160] sm:$0xff] %v1347_v55  ;;  %v1120_v55 = vsel %vm1044_vm14, 102, %v968_v45  ;;  %v978_v35 = vsel %vm902_vm1, %v683_v39, 0  ;;  %vm898_vm10 = vcmp.le.s32.totalorder %v2474_v0, %v3328_v50  ;;  %vm907_vm11 = vcmp.le.s32.totalorder %v2239_v38, %v3380_v17 }
 0x1dc   : > { %1424 = vst [vmem:[%s2496_s8 + $0x168] sm:$0xff] %v1348_v40  ;;  %v993_v40 = vsel %vm917_vm2, %v3863_v27, 0  ;;  %v1130_v22 = vsel %vm1054_vm3, 102, %v978_v35  ;;  %v1146_v61 = vsel %vm1070_vm7, 102, %v994_v49  ;;  %v1375_v13 = vsel %vm917_vm2, 1, %v3850_v8 }
 0x1dd   : > { %1287 = vst [vmem:[%s2502_s11 + $0x1e0] sm:$0xff] %v1211_v54  ;;  %v1207_v54 = vsel %vm1149_vm9, 101, %v1129_v52  ;;  %v1125_v62 = vsel %vm1049_vm8, 102, %v973_v25  ;;  %vm1050_vm12 = vcmp.eq.s32.totalorder %v2474_v0, %v3328_v50  ;;  %vm908_vm14 = vcmp.le.s32.totalorder %v2474_v0, %v3380_v17 }
 0x1de   : > { %1288 = vst [vmem:[%s2502_s11 + $0x1e8] sm:$0xff] %v1134_v16  ;;  %v1359_v16 = vsel %vm901_vm13, 1, %v3850_v8  ;;  %vm1059_vm13 = vcmp.eq.s32.totalorder %v2239_v38, %v3380_v17  ;;  %vm903_vm15 = vcmp.le.s32.totalorder %v2239_v38, %v3415_v34  ;;  %v722_v59 = vsel %vm654_vm0, %v3869_v48, %v3868_v53 }
 0x1df   : > { %1439 = vst [vmem:[%s2496_s8 + $0x1e0] sm:$0xff] %v1363_v47  ;;  %v1145_v47 = vsel %vm1069_vm4, 102, %v993_v40  ;;  %v1355_v24 = vsel %vm897_vm6, 1, %v3850_v8  ;;  %vm1055_vm2 = vcmp.eq.s32.totalorder %v2239_v38, %v3415_v34  ;;  %v1356_v63 = vsel %vm898_vm10, 1, %v3850_v8 }
 0x1e0   : > { %1440 = vst [vmem:[%s2496_s8 + $0x1e8] sm:$0xff] %v1364_v31  ;;  %v1360_v31 = vsel %vm902_vm1, 1, %v3850_v8  ;;  %v1223_v37 = vsel %vm1149_vm9, 101, %v1145_v47  ;;  %vm1060_vm1 = vcmp.eq.s32.totalorder %v2474_v0, %v3380_v17  ;;  %vm904_vm3 = vcmp.le.s32.totalorder %v2474_v0, %v3415_v34 }
 0x1e1   : > { %1267 = vst [vmem:[%s2502_s11 + $0x140] sm:$0xff] %v1191_v21  ;;  %v681_v21 = vsel %vm654_vm0, %v3864_v2, %v3865_v9  ;;  %v727_v50 = vsel %vm654_vm0, %v2533_v56, %v3870_v18  ;;  %v1365_v29 = vsel %vm907_vm11, 1, %v3850_v8  ;;  %v1366_v45 = vsel %vm908_vm14, 1, %v3850_v8  ;;  %v3872_v2 = vld [vmem:[#allocation21_spill] sm:$0xff] }
 0x1e2   : > { %1268 = vst [vmem:[%s2502_s11 + $0x148] sm:$0xff] %v1114_v20  ;;  %v3867_v20 = vld [vmem:[#allocation19_spill] sm:$0xff]  ;;  %v974_v3 = vsel %vm898_vm10, %v681_v21, 0  ;;  %v689_v17 = vsel %vm654_vm0, %v3870_v18, %v2533_v56  ;;  %v1362_v27 = vsel %vm904_vm3, 1, %v3850_v8  ;;  %v687_v40 = vsel %vm654_vm0, %v3871_v41, %v2507_v43 }
 0x1e3   : > { %1419 = vst [vmem:[%s2496_s8 + $0x140] sm:$0xff] %v1343_v26  ;;  %v724_v26 = vsel %vm654_vm0, %v2517_v32, %v3867_v20  ;;  %v1126_v60 = vsel %vm1050_vm12, 102, %v974_v3  ;;  %v728_v49 = vsel %vm654_vm0, %v2531_v19, %v3873_v33 }
 0x1e4   : > { %1420 = vst [vmem:[%s2496_s8 + $0x148] sm:$0xff] %v1344_v36  ;;  %v983_v12 = vsel %vm907_vm11, %v724_v26, 0  ;;  %v3474_v36 = vpop.permute.xlu0 %834 }
 0x1e5   : > { %1277 = vst [vmem:[%s2502_s11 + $0x190] sm:$0xff] %v1201_v10  ;;  %v1376_v10 = vsel %vm918_vm5, 1, %v3850_v8  ;;  %v1135_v42 = vsel %vm1059_vm13, 102, %v983_v12  ;;  %vm913_vm4 = vcmp.le.s32.totalorder %v2239_v38, %v3474_v36  ;;  %vm1056_vm5 = vcmp.eq.s32.totalorder %v2474_v0, %v3415_v34 }
 0x1e6   : > { %1278 = vst [vmem:[%s2502_s11 + $0x198] sm:$0xff] %v1124_v30  ;;  %v1203_v30 = vsel %vm1149_vm9, 101, %v1125_v62  ;;  %v1213_v6 = vsel %vm1149_vm9, 101, %v1135_v42  ;;  %v989_v14 = vsel %vm913_vm4, %v727_v50, 0  ;;  %vm1065_vm6 = vcmp.eq.s32.totalorder %v2239_v38, %v3474_v36 }
 0x1e7   : > { %1429 = vst [vmem:[%s2496_s8 + $0x190] sm:$0xff] %v1353_v51  ;;  %v686_v51 = vsel %vm654_vm0, %v3867_v20, %v2517_v32  ;;  %v979_v32 = vsel %vm903_vm15, %v722_v59, 0  ;;  %vm914_vm7 = vcmp.le.s32.totalorder %v2474_v0, %v3474_v36  ;;  %v1141_v52 = vsel %vm1065_vm6, 102, %v989_v14 }
 0x1e8   : > { %1430 = vst [vmem:[%s2496_s8 + $0x198] sm:$0xff] %v1354_v5  ;;  %v984_v23 = vsel %vm908_vm14, %v686_v51, 0  ;;  %v3512_v5 = vpop.permute.xlu1 %828  ;;  %v990_v35 = vsel %vm914_vm7, %v689_v17, 0  ;;  %vm1066_vm10 = vcmp.eq.s32.totalorder %v2474_v0, %v3474_v36  ;;  %v730_v34 = vsel %vm654_vm0, %v2549_v4, %v3872_v2 }
 0x1e9   : > { %1293 = vst [vmem:[%s2502_s11 + $0x210] sm:$0xff] %v1217_v7  ;;  %v684_v7 = vsel %vm654_vm0, %v3868_v53, %v3869_v48  ;;  %v1136_v15 = vsel %vm1060_vm1, 102, %v984_v23  ;;  %vm909_vm8 = vcmp.le.s32.totalorder %v2239_v38, %v3512_v5  ;;  %vm1061_vm11 = vcmp.eq.s32.totalorder %v2239_v38, %v3512_v5 }
 0x1ea   : > { %1294 = vst [vmem:[%s2502_s11 + $0x218] sm:$0xff] %v1140_v57  ;;  %v1131_v57 = vsel %vm1055_vm2, 102, %v979_v32  ;;  %vm910_vm12 = vcmp.le.s32.totalorder %v2474_v0, %v3512_v5  ;;  %v1142_v9 = vsel %vm1066_vm10, 102, %v990_v35  ;;  %v1371_v46 = vsel %vm913_vm4, 1, %v3850_v8 }
 0x1eb   : > { %1445 = vst [vmem:[%s2496_s8 + $0x210] sm:$0xff] %v1369_v28  ;;  %v980_v28 = vsel %vm904_vm3, %v684_v7, 0  ;;  %vm1062_vm14 = vcmp.eq.s32.totalorder %v2474_v0, %v3512_v5  ;;  %v1372_v47 = vsel %vm914_vm7, 1, %v3850_v8  ;;  %v690_v62 = vsel %vm654_vm0, %v3873_v33, %v2531_v19 }
 0x1ec   : > { %1446 = vst [vmem:[%s2496_s8 + $0x218] sm:$0xff] %v1370_v44  ;;  %v725_v44 = vsel %vm654_vm0, %v2507_v43, %v3871_v41  ;;  %v844_v39 = vpop.permute.xlu0 %843 }
 0x1ed   : > { %1273 = vst [vmem:[%s2502_s11 + $0x170] sm:$0xff] %v1197_v58  ;;  %v1209_v58 = vsel %vm1149_vm9, 101, %v1131_v57  ;;  %v985_v56 = vsel %vm909_vm8, %v725_v44, 0  ;;  %vm919_vm13 = vcmp.le.s32.totalorder %v2239_v38, %v844_v39  ;;  %vm920_vm1 = vcmp.le.s32.totalorder %v2474_v0, %v844_v39 }
 0x1ee   : > { %1274 = vst [vmem:[%s2502_s11 + $0x178] sm:$0xff] %v1120_v55  ;;  %v1132_v55 = vsel %vm1056_vm5, 102, %v980_v28  ;;  %v1137_v43 = vsel %vm1061_vm11, 102, %v985_v56  ;;  %vm1072_vm3 = vcmp.eq.s32.totalorder %v2474_v0, %v844_v39  ;;  %v1377_v36 = vsel %vm919_vm13, 1, %v3850_v8 }
 0x1ef   : > { %1425 = vst [vmem:[%s2496_s8 + $0x170] sm:$0xff] %v1349_v1  ;;  %v1361_v1 = vsel %vm903_vm15, 1, %v3850_v8  ;;  %vm1071_vm15 = vcmp.eq.s32.totalorder %v2239_v38, %v844_v39  ;;  %v1215_v25 = vsel %vm1149_vm9, 101, %v1137_v43  ;;  %v1378_v19 = vsel %vm920_vm1, 1, %v3850_v8 }
 0x1f0   : > { %1426 = vst [vmem:[%s2496_s8 + $0x178] sm:$0xff] %v1350_v11  ;;  %v1219_v11 = vsel %vm1149_vm9, 101, %v1141_v52 }
 0x1f1   : > { %1283 = vst [vmem:[%s2502_s11 + $0x1c0] sm:$0xff] %v1207_v54  ;;  %v838_v54 = vpop.permute.xlu1 %837 }
 0x1f2   : > { %1284 = vst [vmem:[%s2502_s11 + $0x1c8] sm:$0xff] %v1130_v22  ;;  %v986_v22 = vsel %vm910_vm12, %v687_v40, 0  ;;  %vm915_vm2 = vcmp.le.s32.totalorder %v2239_v38, %v838_v54  ;;  %vm1067_vm4 = vcmp.eq.s32.totalorder %v2239_v38, %v838_v54  ;;  %vm916_vm5 = vcmp.le.s32.totalorder %v2474_v0, %v838_v54 }
 0x1f3   : > { %1435 = vst [vmem:[%s2496_s8 + $0x1c0] sm:$0xff] %v1359_v16  ;;  %v995_v16 = vsel %vm919_vm13, %v730_v34, 0  ;;  %v1138_v21 = vsel %vm1062_vm14, 102, %v986_v22  ;;  %vm1068_vm6 = vcmp.eq.s32.totalorder %v2474_v0, %v838_v54  ;;  %v1373_v59 = vsel %vm915_vm2, 1, %v3850_v8 }
 0x1f4   : > { %1436 = vst [vmem:[%s2496_s8 + $0x1c8] sm:$0xff] %v1360_v31  ;;  %v692_v31 = vsel %vm654_vm0, %v3872_v2, %v2549_v4  ;;  %v1147_v20 = vsel %vm1071_vm15, 102, %v995_v16  ;;  %v991_v4 = vsel %vm915_vm2, %v728_v49, 0 }
 0x1f5   : > { %1299 = vst [vmem:[%s2502_s11 + $0x240] sm:$0xff] %v1223_v37  ;;  %v1367_v37 = vsel %vm909_vm8, 1, %v3850_v8  ;;  %v996_v26 = vsel %vm920_vm1, %v692_v31, 0  ;;  %v1143_v12 = vsel %vm1067_vm4, 102, %v991_v4 }
 0x1f6   : > { %1300 = vst [vmem:[%s2502_s11 + $0x248] sm:$0xff] %v1146_v61  ;;  %v1368_v61 = vsel %vm910_vm12, 1, %v3850_v8  ;;  %v1148_v3 = vsel %vm1072_vm3, 102, %v996_v26  ;;  %v1221_v53 = vsel %vm1149_vm9, 101, %v1143_v12 }
 0x1f7   : > { %1451 = vst [vmem:[%s2496_s8 + $0x240] sm:$0xff] %v1375_v13  ;;  %v1225_v13 = vsel %vm1149_vm9, 101, %v1147_v20 }
 0x1f8   : > { %1452 = vst [vmem:[%s2496_s8 + $0x248] sm:$0xff] %v1376_v10  ;;  %v992_v10 = vsel %vm916_vm5, %v690_v62, 0 }
 0x1f9   : > { %1279 = vst [vmem:[%s2502_s11 + $0x1a0] sm:$0xff] %v1203_v30  ;;  %v1144_v48 = vsel %vm1068_vm6, 102, %v992_v10  ;;  %v1374_v30 = vsel %vm916_vm5, 1, %v3850_v8 }
 0x1fa   : > { %1280 = vst [vmem:[%s2502_s11 + $0x1a8] sm:$0xff] %v1126_v60 }
 0x1fb   : > { %1431 = vst [vmem:[%s2496_s8 + $0x1a0] sm:$0xff] %v1355_v24 }
 0x1fc   : > { %1432 = vst [vmem:[%s2496_s8 + $0x1a8] sm:$0xff] %v1356_v63 }
 0x1fd   : > { %1289 = vst [vmem:[%s2502_s11 + $0x1f0] sm:$0xff] %v1213_v6 }
 0x1fe   : > { %1290 = vst [vmem:[%s2502_s11 + $0x1f8] sm:$0xff] %v1136_v15 }
 0x1ff   : > { %1441 = vst [vmem:[%s2496_s8 + $0x1f0] sm:$0xff] %v1365_v29 }
 0x200   : > { %1442 = vst [vmem:[%s2496_s8 + $0x1f8] sm:$0xff] %v1366_v45 }
 0x201   : > { %1285 = vst [vmem:[%s2502_s11 + $0x1d0] sm:$0xff] %v1209_v58 }
 0x202   : > { %1286 = vst [vmem:[%s2502_s11 + $0x1d8] sm:$0xff] %v1132_v55 }
 0x203   : > { %1437 = vst [vmem:[%s2496_s8 + $0x1d0] sm:$0xff] %v1361_v1 }
 0x204   : > { %1438 = vst [vmem:[%s2496_s8 + $0x1d8] sm:$0xff] %v1362_v27 }
 0x205   : > { %1295 = vst [vmem:[%s2502_s11 + $0x220] sm:$0xff] %v1219_v11 }
 0x206   : > { %1296 = vst [vmem:[%s2502_s11 + $0x228] sm:$0xff] %v1142_v9 }
 0x207   : > { %1447 = vst [vmem:[%s2496_s8 + $0x220] sm:$0xff] %v1371_v46 }
 0x208   : > { %1448 = vst [vmem:[%s2496_s8 + $0x228] sm:$0xff] %v1372_v47 }
 0x209   : > { %1291 = vst [vmem:[%s2502_s11 + $0x200] sm:$0xff] %v1215_v25 }
 0x20a   : > { %1292 = vst [vmem:[%s2502_s11 + $0x208] sm:$0xff] %v1138_v21 }
 0x20b   : > { %1443 = vst [vmem:[%s2496_s8 + $0x200] sm:$0xff] %v1367_v37 }
 0x20c   : > { %1444 = vst [vmem:[%s2496_s8 + $0x208] sm:$0xff] %v1368_v61 }
 0x20d   : > { %1301 = vst [vmem:[%s2502_s11 + $0x250] sm:$0xff] %v1225_v13 }
 0x20e   : > { %1302 = vst [vmem:[%s2502_s11 + $0x258] sm:$0xff] %v1148_v3 }
 0x20f   : > { %1453 = vst [vmem:[%s2496_s8 + $0x250] sm:$0xff] %v1377_v36 }
 0x210   : > { %1454 = vst [vmem:[%s2496_s8 + $0x258] sm:$0xff] %v1378_v19  ;;  %1467 = sbr.rel (!%p1961_p9) target bundleno = 565 (0x235), region = 36 }
 0x211   : > { %1297 = vst [vmem:[%s2502_s11 + $0x230] sm:$0xff] %v1221_v53 }
 0x212   : > { %1298 = vst [vmem:[%s2502_s11 + $0x238] sm:$0xff] %v1144_v48 }
 0x213   : > { %1449 = vst [vmem:[%s2496_s8 + $0x230] sm:$0xff] %v1373_v59 }
 0x214   : > { %1450 = vst [vmem:[%s2496_s8 + $0x238] sm:$0xff] %v1374_v30 }
 0x215   : > { %s3888_s29 = smov (!%p1470_p11, %s1469_s29), 38 }
 0x216   : > { %s1660_s25 = sshll.u32 %s3888_s29, 4 }
 0x217   : > { %s1474_s27 = ssub.s32 608, %s1660_s25 }
 0x218   : > { %s1475_s30 = sshll.u32 %s1474_s27, 4 }
 0x219   : > { %1476 = vsyncadd %s3822_s17, %s1475_s30  ;;  %p3699_p13 = scmp.ne.s32.totalorder %s1660_s25, 0  ;;  %s1667_s28 = smul.u32 608, %s1938_s16 }
 0x21a   : > { %s1482_s5 = sshll.u32 %s2502_s11, 4  ;;  %s3821_s9 = sshll.u32 %s3888_s29, 8  ;;  %s3709_s5 = int_to_ptr.vmem [resolvable:$true] %s1482_s5 }
 0x21b   : > { %s1480_s4 = scalar_lea.hbm %s3799_s2, %s1667_s28  ;;  %s1764_s27 = sshra.s32 %s3709_s5, 4  ;;  %s1765_s27 = int_to_ptr.vmem [resolvable:$true] %s1764_s27 }
 0x21c   : > { %s1484_s6 = sshll.u32 %s1480_s4, 4  ;;  %s1766_s25 = sshrl.u32 %s3821_s9, 4  ;;  %s3711_s6 = int_to_ptr.hbm [resolvable:$true] %s1484_s6 }
 0x21d   : > { %s1771_s30 = scalar_lea.vmem %s1765_s27, %s1766_s25  ;;  %s1891_s11 = smov [#allocation5]  }
 0x21e   : > { %p1772_p5 = scmp.ne.s32.totalorder %s1765_s27, %s1771_s30  ;;  %s1775_s19 = scalar_lea.vmem %s1891_s11, 1216 }
 0x21f   : > { %p1777_p12 = scmp.lt.s32.totalorder %s1775_s19, %s1771_s30 }
 0x220   : > { %p1773_p7 = pnand %p1772_p5, %p3699_p13 }
 0x222   : > { %p1774_p8 = pneg %p1773_p7 }
 0x224   : > { %p1779_p0 = pnand %p1777_p12, %p1774_p8 }
 0x226   : > { %1782 = shalt.err (!%p1779_p0)
}
 0x227   : > { %s1783_s28 = sshra.s32 %s3711_s6, 4  ;;  %s1794_s27 = scalar_lea.hbm %s3799_s2, 1200  ;;  %s1784_s28 = int_to_ptr.hbm [resolvable:$true] %s1783_s28 }
 0x228   : > { %s1790_s10 = scalar_lea.hbm %s1784_s28, %s1766_s25  ;;  %p1795_p4 = scmp.lt.s32.totalorder %s1784_s28, %s3799_s2 }
 0x229   : > { %p1791_p1 = scmp.ne.s32.totalorder %s1784_s28, %s1790_s10  ;;  %p1796_p6 = scmp.lt.s32.totalorder %s1794_s27, %s1790_s10 }
 0x22b   : > { %p1792_p2 = pnand %p1791_p1, %p3699_p13  ;;  %p1797_p11 = por %p1796_p6, %p1795_p4 }
 0x22d   : > { %p1793_p3 = pneg %p1792_p2 }
 0x22f   : > { %p1798_p5 = pnand %p1797_p11, %p1793_p3 }
 0x231   : > { %1801 = shalt.err (!%p1798_p5)
}
 0x232   : > { %s1892_s19 = smov 256   ;;  %s1893_s25 = smov 16  }
 0x233   : > { %s3875_s30 = scalar_lea.sflag [#allocation4], %s2020_s26  ;;  %s3876_s11 = sshll.u32 %s3888_s29, 8 }
 0x234   : > { %1490 = dma.vmem_to_hbm [thread:$0]  (%p3699_p13), %s3709_s5, %s3876_s11, %s3711_s6, %s3875_s30, %s1892_s19, %s1892_s19, %s1893_s25  }
 0x235 PF: > { %1493 = sbr.rel (!%p1961_p9) target bundleno = 602 (0x25a), region = 40  ;;  %s1495_s17 = ssub.s32 (%p1961_p9), 75, %s2217_s22 }
 0x236   : > { %p1496_p7 = scmp.lt.s32.totalorder (%p1961_p9), %s1495_s17, 38  ;;  %s3877_s20 = scalar_lea.sflag (%p1961_p9), [#allocation7], %s2020_s26 }
 0x23a   : > { %s3890_s17 = smov (!%p1496_p7, %s1495_s17), 38 }
 0x23b   : > { %s1663_s9 = sshll.u32 %s3890_s17, 4 }
 0x23c   : > { %s1500_s28 = ssub.s32 608, %s1663_s9 }
 0x23d   : > { %s1501_s10 = sshll.u32 %s1500_s28, 4 }
 0x23e   : > { %1502 = vsyncadd %s3877_s20, %s1501_s10  ;;  %p3743_p13 = scmp.ne.s32.totalorder %s1663_s9, 0  ;;  %s1668_s23 = smul.u32 608, %s1938_s16 }
 0x23f   : > { %s1508_s22 = sshll.u32 %s2496_s8, 4  ;;  %s1654_s7 = sshll.u32 %s3890_s17, 8  ;;  %s3753_s22 = int_to_ptr.vmem [resolvable:$true] %s1508_s22 }
 0x240   : > { %s1506_s4 = scalar_lea.hbm %s3800_s3, %s1668_s23  ;;  %s1803_s19 = sshra.s32 %s3753_s22, 4  ;;  %s1804_s19 = int_to_ptr.vmem [resolvable:$true] %s1803_s19 }
 0x241   : > { %s1510_s27 = sshll.u32 %s1506_s4, 4  ;;  %s1805_s25 = sshrl.u32 %s1654_s7, 4  ;;  %s3755_s27 = int_to_ptr.hbm [resolvable:$true] %s1510_s27 }
 0x242   : > { %s1810_s30 = scalar_lea.vmem %s1804_s19, %s1805_s25  ;;  %s1894_s16 = smov [#allocation6]  }
 0x243   : > { %p1811_p9 = scmp.ne.s32.totalorder %s1804_s19, %s1810_s30  ;;  %s1814_s8 = scalar_lea.vmem %s1894_s16, 1216 }
 0x244   : > { %p1816_p0 = scmp.lt.s32.totalorder %s1814_s8, %s1810_s30 }
 0x245   : > { %p1812_p8 = pnand %p1811_p9, %p3743_p13 }
 0x247   : > { %p1813_p12 = pneg %p1812_p8 }
 0x249   : > { %p1818_p1 = pnand %p1816_p0, %p1813_p12 }
 0x24b   : > { %1821 = shalt.err (!%p1818_p1)
}
 0x24c   : > { %s1822_s11 = sshra.s32 %s3755_s27, 4  ;;  %s1833_s20 = scalar_lea.hbm %s3800_s3, 1200  ;;  %s1823_s11 = int_to_ptr.hbm [resolvable:$true] %s1822_s11 }
 0x24d   : > { %s1829_s9 = scalar_lea.hbm %s1823_s11, %s1805_s25  ;;  %p1834_p6 = scmp.lt.s32.totalorder %s1823_s11, %s3800_s3 }
 0x24e   : > { %p1830_p2 = scmp.ne.s32.totalorder %s1823_s11, %s1829_s9  ;;  %p1835_p11 = scmp.lt.s32.totalorder %s1833_s20, %s1829_s9 }
 0x250   : > { %p1831_p3 = pnand %p1830_p2, %p3743_p13  ;;  %p1836_p5 = por %p1835_p11, %p1834_p6 }
 0x252   : > { %p1832_p4 = pneg %p1831_p3 }
 0x254   : > { %p1837_p7 = pnand %p1836_p5, %p1832_p4 }
 0x256   : > { %1840 = shalt.err (!%p1837_p7)
}
 0x257   : > { %s1895_s6 = smov 256   ;;  %s1896_s4 = smov 16  }
 0x258   : > { %s3879_s19 = scalar_lea.sflag [#allocation7], %s2020_s26 }
 0x259   : > { %1516 = dma.vmem_to_hbm [thread:$0]  (%p3743_p13), %s3753_s22, %s1654_s7, %s3755_s27, %s3879_s19, %s1895_s6, %s1895_s6, %s1896_s4  }
 0x25a PF: > { %s1525_s25 = sand.u32 1, %s1872_s12   ;;  %p3880_p9 = scmp.ge.s32.totalorder %s1884_s15, 2 }
 0x25b   : > { %s1526_s30 = scalar_lea.sflag [#allocation4], %s1525_s25 }
 0x25c   : > { %p1675_p8 = pnand %p3880_p9, %p1965_p10 }
 0x25e   : > { %p1676_p12 = pneg %p1675_p8 }
 0x260   : > { %1863 = dma.done.wait (%p1676_p12), %s1526_s30, 9728  }
 0x261   : > { %1865 = vsyncadd (%p1676_p12), %s1526_s30, 4294957568  ;;  %s1536_s16 = scalar_lea.sflag [#allocation7], %s1525_s25 }
 0x262   : > { %1867 = dma.done.wait (%p1676_p12), %s1536_s16, 9728  }
 0x263   : > { %1869 = vsyncadd (%p1676_p12), %s1536_s16, 4294957568  ;;  %p20_p13 = scmp.ge.s32.totalorder %s1942_s18, 4   ;;  %s3881_s12 = smov %s1876_s13 }
 0x264   : > { %s3882_s13 = smov %s1880_s14  ;;  %s3883_s14 = smov %s1954_s21 }
 0x265   : > { %s3884_s15 = smov %s1942_s18  ;;  %22 = sbr.rel (!%p20_p13) target bundleno = 7 (0x7), region = 93 }
 0x26a   :  { %1542 = vsyncpa [#allocation3], 1 }
 0x26b   :  { %1544 = vsyncpa [#allocation3 + $0x1], 1 }
 0x26c   :  { %1545 = vsyncpa [#allocation4], 1 }
 0x26d   :  { %1547 = vsyncpa [#allocation4 + $0x1], 1 }
 0x26e   :  { %1548 = vsyncpa [#allocation7], 1 }
 0x26f   :  { %1550 = vsyncpa [#allocation7 + $0x1], 1 }

</bundles_post_ra>
